<compile_context>
chip_gen: v7x
topology: tpu7x:2x2x1
jax: 0.10.0
libtpu: 0.0.40
codegen_flags: <defaults>
</compile_context>

<pallas_src>
import jax
import jax.numpy as jnp
from jax.experimental import pallas as pl
from jax.experimental.pallas import tpu as pltpu

_VMEM_LIMIT = 48 * 1024 * 1024  # safe on v5e/v6e (128 MiB) and v7x (64 MiB)


def _round_up(x, m):
    return (x + m - 1) // m * m


def _pick_tile(dim, cap, base=128):
    """Largest multiple of `base` <= cap that divides round_up(dim, base)."""
    dp = _round_up(dim, base)
    best = base
    t = base
    while t <= min(cap, dp):
        if dp % t == 0:
            best = t
        t += base
    return best


# ---------------------------------------------------------------------------
# Fused GEMM + BN(scale/shift) + optional residual + optional ReLU kernel
# (used for the stem conv, stride-2 convs and 1x1 downsample convs)
# ---------------------------------------------------------------------------
def _make_mm_kernel(has_res: bool, act: bool):
    def kernel(*refs):
        if has_res:
            x_ref, w_ref, s_ref, b_ref, r_ref, o_ref, acc_ref = refs
        else:
            x_ref, w_ref, s_ref, b_ref, o_ref, acc_ref = refs
        k = pl.program_id(2)

        @pl.when(k == 0)
        def _():
            acc_ref[...] = jnp.zeros_like(acc_ref)

        acc_ref[...] += jnp.dot(x_ref[...], w_ref[...],
                                preferred_element_type=jnp.float32)

        @pl.when(k == pl.num_programs(2) - 1)
        def _():
            y = acc_ref[...] * s_ref[...] + b_ref[...]
            if has_res:
                y = y + r_ref[...].astype(jnp.float32)
            if act:
                y = jnp.maximum(y, 0.0)
            o_ref[...] = y.astype(o_ref.dtype)

    return kernel


def matmul_bn_act(x, w, scale, shift, residual=None, act=True,
                  out_dtype=jnp.bfloat16):
    """Fused (x @ w) * scale + shift [+ residual] [ReLU].  x:(M,K), w:(K,N)."""
    M, K = x.shape
    K2, N = w.shape
    assert K == K2
    Mp, Kp, Np = _round_up(M, 128), _round_up(K, 128), _round_up(N, 128)

    tn = _pick_tile(N, 128)
    tk = _pick_tile(K, 1536)
    tm = _pick_tile(M, 512)
    # keep >=2 parallel (i, j) blocks when possible (megacore / 2-TC chips)
    while tm > 128 and (Mp // tm) * (Np // tn) < 2:
        tm = _pick_tile(M, tm - 128)

    xp = jnp.pad(x.astype(jnp.bfloat16), ((0, Mp - M), (0, Kp - K)))
    wp = jnp.pad(w.astype(jnp.bfloat16), ((0, Kp - K), (0, Np - N)))
    sp = jnp.pad(scale.reshape(1, N).astype(jnp.float32), ((0, 0), (0, Np - N)))
    bp = jnp.pad(shift.reshape(1, N).astype(jnp.float32), ((0, 0), (0, Np - N)))

    has_res = residual is not None
    inputs = [xp, wp, sp, bp]
    in_specs = [
        pl.BlockSpec((tm, tk), lambda i, j, k: (i, k)),
        pl.BlockSpec((tk, tn), lambda i, j, k: (k, j)),
        pl.BlockSpec((1, tn), lambda i, j, k: (0, j)),
        pl.BlockSpec((1, tn), lambda i, j, k: (0, j)),
    ]
    if has_res:
        rp = jnp.pad(residual.astype(jnp.bfloat16),
                     ((0, Mp - M), (0, Np - N)))
        inputs.append(rp)
        in_specs.append(pl.BlockSpec((tm, tn), lambda i, j, k: (i, j)))

    out = pl.pallas_call(
        _make_mm_kernel(has_res, act),
        out_shape=jax.ShapeDtypeStruct((Mp, Np), out_dtype),
        grid_spec=pltpu.PrefetchScalarGridSpec(
            num_scalar_prefetch=0,
            grid=(Mp // tm, Np // tn, Kp // tk),
            in_specs=in_specs,
            out_specs=pl.BlockSpec((tm, tn), lambda i, j, k: (i, j)),
            scratch_shapes=[pltpu.VMEM((tm, tn), jnp.float32)]),
        compiler_params=pltpu.CompilerParams(
            dimension_semantics=("parallel", "parallel", "arbitrary"),
            vmem_limit_bytes=_VMEM_LIMIT),
    )(*inputs)
    return out[:M, :N]


# ---------------------------------------------------------------------------
# Direct (fused-im2col) kernel for 3x3x3, stride=1, pad=1 convolutions.
# Grid = (N, Do, Cout_tiles, kd); one padded (H,W) plane is streamed per step,
# the 9 (kh, kw) taps are built in VMEM (never in HBM) and contracted in a
# single GEMM; BN scale/shift (+residual, +ReLU) fused into the last kd step.
# ---------------------------------------------------------------------------
def _make_direct_conv_kernel(kk, wp_, m2, act, has_res):
    def kernel(*refs):
        if has_res:
            x_ref, w_ref, s_ref, b_ref, r_ref, o_ref, acc_ref = refs
        else:
            x_ref, w_ref, s_ref, b_ref, o_ref, acc_ref = refs
        kd = pl.program_id(3)

        @pl.when(kd == 0)
        def _():
            acc_ref[...] = jnp.zeros_like(acc_ref)

        x2 = x_ref[0]                                  # (PR, Cin) bf16
        parts = []
        for kh in range(kk):
            for kw in range(kk):
                off = kh * wp_ + kw
                parts.append(x2[off:off + m2, :])      # static contiguous slice
        patch = jnp.concatenate(parts, axis=-1)        # (M2, kk*kk*Cin)
        acc_ref[...] += jnp.dot(patch, w_ref[0],
                                preferred_element_type=jnp.float32)

        @pl.when(kd == kk - 1)
        def _():
            y = acc_ref[...] * s_ref[...] + b_ref[...]
            if has_res:
                y = y + r_ref[0].astype(jnp.float32)
            if act:
                y = jnp.maximum(y, 0.0)
            o_ref[0] = y.astype(o_ref.dtype)

    return kernel


def conv3x3s1_bn_act(x, w, scale, shift, act=True, residual=None):
    """3x3x3 conv, stride 1, pad 1, fused BN/residual/ReLU.  x: (N,D,H,W,C)."""
    N, D, H, W, C = x.shape
    Cout = w.shape[-1]
    Do, Ho, Wo = D, H, W
    Dp = D + 2
    Wp = W + 2
    PR = (H + 4) * Wp          # extra 2 zero H-rows so junk columns stay in-bounds
    M2 = Ho * Wp               # output rows incl. 2 junk W-columns per row

    xpad = jnp.pad(x.astype(jnp.bfloat16),
                   ((0, 0), (1, 1), (1, 3), (1, 1), (0, 0)))
    xplanes = xpad.reshape(N * Dp, PR, C)
    wmat = w.astype(jnp.bfloat16).reshape(3, 9 * C, Cout)
    sp = scale.reshape(1, Cout).astype(jnp.float32)
    bp = shift.reshape(1, Cout).astype(jnp.float32)

    tn = Cout if Cout <= 128 else 128
    assert Cout % tn == 0
    J = Cout // tn

    has_res = residual is not None
    inputs = [xplanes, wmat, sp, bp]
    in_specs = [
        pl.BlockSpec((1, PR, C), lambda n, d, j, kd: (n * Dp + d + kd, 0, 0)),
        pl.BlockSpec((1, 9 * C, tn), lambda n, d, j, kd: (kd, 0, j)),
        pl.BlockSpec((1, tn), lambda n, d, j, kd: (0, j)),
        pl.BlockSpec((1, tn), lambda n, d, j, kd: (0, j)),
    ]
    if has_res:
        rp = jnp.pad(residual.astype(jnp.bfloat16),
                     ((0, 0), (0, 0), (0, 0), (0, 2), (0, 0)))
        rp = rp.reshape(N * Do, M2, Cout)
        inputs.append(rp)
        in_specs.append(
            pl.BlockSpec((1, M2, tn), lambda n, d, j, kd: (n * Do + d, 0, j)))

    out = pl.pallas_call(
        _make_direct_conv_kernel(3, Wp, M2, act, has_res),
        out_shape=jax.ShapeDtypeStruct((N * Do, M2, Cout), jnp.bfloat16),
        grid_spec=pltpu.PrefetchScalarGridSpec(
            num_scalar_prefetch=0,
            grid=(N, Do, J, 3),
            in_specs=in_specs,
            out_specs=pl.BlockSpec((1, M2, tn),
                                   lambda n, d, j, kd: (n * Do + d, 0, j)),
            scratch_shapes=[pltpu.VMEM((M2, tn), jnp.float32)]),
        compiler_params=pltpu.CompilerParams(
            dimension_semantics=("parallel", "parallel", "parallel",
                                 "arbitrary"),
            vmem_limit_bytes=_VMEM_LIMIT),
    )(*inputs)
    out = out.reshape(N, Do, Ho, Wp, Cout)[:, :, :, :Wo, :]
    return out


# ---------------------------------------------------------------------------
# im2col (host glue) + fused GEMM path: stem conv, stride-2 convs, 1x1 convs
# ---------------------------------------------------------------------------
def _extract_patches(x, k, stride, pad):
    N, D, H, W, C = x.shape
    xp = jnp.pad(x, ((0, 0), (pad, pad), (pad, pad), (pad, pad), (0, 0)))
    Do = (D + 2 * pad - k) // stride + 1
    Ho = (H + 2 * pad - k) // stride + 1
    Wo = (W + 2 * pad - k) // stride + 1
    wins = []
    for kd in range(k):
        for kh in range(k):
            for kw in range(k):
                wins.append(xp[:, kd:kd + stride * Do:stride,
                               kh:kh + stride * Ho:stride,
                               kw:kw + stride * Wo:stride, :])
    p = jnp.stack(wins, axis=-2)            # (N, Do, Ho, Wo, k^3, C)
    return p.reshape(N * Do * Ho * Wo, k * k * k * C), (N, Do, Ho, Wo)


def conv3d_gemm_bn_act(x, w, bn_scale, bn_shift, stride=1, pad=1,
                       act=True, residual=None):
    k = w.shape[0]
    cout = w.shape[-1]
    if k == 1:
        xs = x[:, ::stride, ::stride, ::stride, :]
        N, Do, Ho, Wo, C = xs.shape
        patches = xs.reshape(N * Do * Ho * Wo, C)
        shape = (N, Do, Ho, Wo)
    else:
        patches, shape = _extract_patches(x, k, stride, pad)
    wm = w.reshape(-1, cout)
    res_flat = residual.reshape(-1, cout) if residual is not None else None
    out = matmul_bn_act(patches, wm, bn_scale, bn_shift,
                        residual=res_flat, act=act)
    N, Do, Ho, Wo = shape
    return out.reshape(N, Do, Ho, Wo, cout)


# ---------------------------------------------------------------------------
# MaxPool3d (k=3, s=2, p=1) as three separable gridded max-of-3 kernels
# ---------------------------------------------------------------------------
def _max3_kernel(x_ref, o_ref):
    o_ref[...] = jnp.maximum(jnp.maximum(x_ref[0], x_ref[1]), x_ref[2])


def _pool_axis_max(x, axis, k=3, stride=2, pad=1):
    neg = jnp.finfo(x.dtype).min
    size = x.shape[axis]
    out_size = (size + 2 * pad - k) // stride + 1
    pad_cfg = [(0, 0)] * x.ndim
    pad_cfg[axis] = (pad, pad + stride)      # extra -inf on the right: harmless
    xp = jnp.pad(x, pad_cfg, constant_values=neg)

    slices = []
    for kk in range(k):
        idx = [slice(None)] * x.ndim
        idx[axis] = slice(kk, kk + stride * out_size, stride)
        slices.append(xp[tuple(idx)])
    stacked = jnp.stack(slices, axis=0)

    C = x.shape[-1]
    Mi = stacked.size // (k * C)
    st = stacked.reshape(k, Mi, C)
    tm = min(1024, _round_up(Mi, 8))
    Mp = _round_up(Mi, tm)
    st = jnp.pad(st, ((0, 0), (0, Mp - Mi), (0, 0)), constant_values=neg)

    out = pl.pallas_call(
        _max3_kernel,
        out_shape=jax.ShapeDtypeStruct((Mp, C), x.dtype),
        grid_spec=pltpu.PrefetchScalarGridSpec(
            num_scalar_prefetch=0,
            grid=(Mp // tm,),
            in_specs=[pl.BlockSpec((k, tm, C), lambda i: (0, i, 0))],
            out_specs=pl.BlockSpec((tm, C), lambda i: (i, 0))),
        compiler_params=pltpu.CompilerParams(
            dimension_semantics=("parallel",),
            vmem_limit_bytes=_VMEM_LIMIT),
    )(st)
    out = out[:Mi]
    new_shape = list(x.shape)
    new_shape[axis] = out_size
    return out.reshape(new_shape)


def maxpool3d(x, k=3, stride=2, pad=1):
    # separable 3-D max pool (exact: max commutes across axes)
    x = _pool_axis_max(x, axis=3, k=k, stride=stride, pad=pad)
    x = _pool_axis_max(x, axis=2, k=k, stride=stride, pad=pad)
    x = _pool_axis_max(x, axis=1, k=k, stride=stride, pad=pad)
    return x


# ---------------------------------------------------------------------------
# Global average pool (AdaptiveAvgPool3d((1,1,1)) + flatten), gridded over N
# ---------------------------------------------------------------------------
def _avgpool_kernel(x_ref, o_ref):
    o_ref[...] = jnp.mean(x_ref[...].astype(jnp.float32), axis=1,
                          keepdims=True)


def global_avgpool(x):
    N, D, H, W, C = x.shape
    S = D * H * W
    xf = x.reshape(N, S, C)
    out = pl.pallas_call(
        _avgpool_kernel,
        out_shape=jax.ShapeDtypeStruct((N, 1, C), jnp.float32),
        grid_spec=pltpu.PrefetchScalarGridSpec(
            num_scalar_prefetch=0,
            grid=(N,),
            in_specs=[pl.BlockSpec((1, S, C), lambda i: (i, 0, 0))],
            out_specs=pl.BlockSpec((1, 1, C), lambda i: (i, 0, 0))),
        compiler_params=pltpu.CompilerParams(
            dimension_semantics=("parallel",),
            vmem_limit_bytes=_VMEM_LIMIT),
    )(xf)
    return out.reshape(N, C)


# ---------------------------------------------------------------------------
# ResNet (BasicBlock) forward
# ---------------------------------------------------------------------------
def basic_block(x, p):
    identity = x
    s = p["stride"]
    if s == 1:
        out = conv3x3s1_bn_act(x, p["conv1_w"], p["bn1_s"], p["bn1_b"],
                               act=True)
    else:
        out = conv3d_gemm_bn_act(x, p["conv1_w"], p["bn1_s"], p["bn1_b"],
                                 stride=s, pad=1, act=True)
    if "ds_w" in p:
        identity = conv3d_gemm_bn_act(x, p["ds_w"], p["ds_bn_s"], p["ds_bn_b"],
                                      stride=s, pad=0, act=False)
    # conv2 -> bn2 -> (+identity) -> ReLU, all fused in one kernel call
    out = conv3x3s1_bn_act(out, p["conv2_w"], p["bn2_s"], p["bn2_b"],
                           act=True, residual=identity)
    return out


def resnet_forward(x_ncdhw, params):
    x = jnp.transpose(x_ncdhw, (0, 2, 3, 4, 1)).astype(jnp.bfloat16)  # NDHWC
    x = conv3d_gemm_bn_act(x, params["conv1_w"], params["bn1_s"],
                           params["bn1_b"], stride=2, pad=3, act=True)
    x = maxpool3d(x, k=3, stride=2, pad=1)
    for blk in params["blocks"]:
        x = basic_block(x, blk)
    pooled = global_avgpool(x)                          # (N, C) f32
    # tiny FC left to XLA: a Pallas launch would be pure overhead for (2,10).
    logits = pooled @ params["fc_w"] + params["fc_b"]
    return logits


# ---------------------------------------------------------------------------
# Deterministic parameter initialization (mirrors module __init__ shapes)
# ---------------------------------------------------------------------------
def init_params(key, n_input_channels=3, planes=(64, 128), layers=(1, 1),
                num_classes=10, eps=1e-5):
    keys = list(jax.random.split(key, 64))
    kit = iter(keys)

    def conv_w(k, cin, cout):
        fan_out = cout * k ** 3
        std = (2.0 / fan_out) ** 0.5
        return std * jax.random.normal(next(kit), (k, k, k, cin, cout),
                                       jnp.float32)

    def bn(c):
        gamma = jnp.ones((c,), jnp.float32)
        beta = jnp.zeros((c,), jnp.float32)
        mean = jnp.zeros((c,), jnp.float32)
        var = jnp.ones((c,), jnp.float32)
        scale = gamma / jnp.sqrt(var + eps)
        shift = beta - mean * scale
        return scale, shift

    params = {}
    inplanes = 64
    params["conv1_w"] = conv_w(7, n_input_channels, inplanes)
    params["bn1_s"], params["bn1_b"] = bn(inplanes)

    blocks = []
    strides = [1] + [2] * (len(layers) - 1)
    for n_planes, n_blocks, stride in zip(planes, layers, strides):
        for b in range(n_blocks):
            s = stride if b == 0 else 1
            blk = {"stride": s}
            blk["conv1_w"] = conv_w(3, inplanes, n_planes)
            blk["bn1_s"], blk["bn1_b"] = bn(n_planes)
            blk["conv2_w"] = conv_w(3, n_planes, n_planes)
            blk["bn2_s"], blk["bn2_b"] = bn(n_planes)
            if s != 1 or inplanes != n_planes:       # BasicBlock.expansion == 1
                blk["ds_w"] = conv_w(1, inplanes, n_planes)
                blk["ds_bn_s"], blk["ds_bn_b"] = bn(n_planes)
            inplanes = n_planes
            blocks.append(blk)
    params["blocks"] = blocks

    fc_in = planes[-1]  # * BasicBlock.expansion (=1)
    bound = 1.0 / (fc_in ** 0.5)
    params["fc_w"] = jax.random.uniform(next(kit), (fc_in, num_classes),
                                        jnp.float32, -bound, bound)
    params["fc_b"] = jax.random.uniform(next(kit), (num_classes,),
                                        jnp.float32, -bound, bound)
    return params


if __name__ == "__main__":
    key = jax.random.PRNGKey(0)
    pkey, xkey = jax.random.split(key)
    params = init_params(pkey, n_input_channels=3, planes=(64, 128),
                         layers=(1, 1), num_classes=10)
    # PyTorch-style NCDHW input: (batch=2, C=3, D=8, H=16, W=16)
    x = jax.random.normal(xkey, (2, 3, 8, 16, 16), jnp.float32)

    out = resnet_forward(x, params)
    out = jax.block_until_ready(out)
    assert out.shape == (2, 10), out.shape
    assert bool(jnp.all(jnp.isfinite(out)))
    print("KERNEL_OK")
</pallas_src>

<mosaic_0001>
module attributes {stable_mosaic.version = 11 : i64} {
  func.func @kernel(%arg0: i32, %arg1: i32, %arg2: i32, %arg3: memref<256x1152xbf16, #tpu.memory_space<vmem>>, %arg4: memref<1152x128xbf16, #tpu.memory_space<vmem>>, %arg5: memref<1x128xf32, #tpu.memory_space<vmem>>, %arg6: memref<1x128xf32, #tpu.memory_space<vmem>>, %arg7: memref<256x128xbf16, #tpu.memory_space<vmem>>, %arg8: memref<256x128xf32, #tpu.memory_space<vmem>>) attributes {dimension_semantics = [#tpu.dimension_semantics<parallel>, #tpu.dimension_semantics<parallel>, #tpu.dimension_semantics<arbitrary>], iteration_bounds = array<i64: 2, 1, 1>, scalar_prefetch = 0 : i64, scratch_operands = 1 : i64, tpu.core_type = #tpu.core_type<tc>, window_params = [{transform_indices = @transform_0, window_bounds = array<i64: 256, 1152>}, {transform_indices = @transform_1, window_bounds = array<i64: 1152, 128>}, {transform_indices = @transform_2, window_bounds = array<i64: 1, 128>}, {transform_indices = @transform_3, window_bounds = array<i64: 1, 128>}, {transform_indices = @transform_4, window_bounds = array<i64: 256, 128>}]} {
    %c0_i32 = arith.constant 0 : i32
    %0 = arith.cmpi eq, %arg2, %c0_i32 : i32
    %1 = arith.extui %0 : i1 to i32
    %c0_i32_0 = arith.constant 0 : i32
    %2 = arith.cmpi ne, %1, %c0_i32_0 : i32
    scf.if %2 {
      %cst_10 = arith.constant 0.000000e+00 : f32
      %12 = vector.broadcast %cst_10 : f32 to vector<256x128xf32>
      %c0_11 = arith.constant 0 : index
      %c0_12 = arith.constant 0 : index
      %13 = vector.load %arg8[%c0_11, %c0_12] : memref<256x128xf32, #tpu.memory_space<vmem>>, vector<256x128xf32>
      tpu.vector_store %arg8[%c0_11, %c0_12], %12 {strides = array<i32>} : memref<256x128xf32, #tpu.memory_space<vmem>>, vector<256x128xf32>,
    } else {
    }
    %c0 = arith.constant 0 : index
    %c0_1 = arith.constant 0 : index
    %3 = vector.load %arg8[%c0, %c0_1] : memref<256x128xf32, #tpu.memory_space<vmem>>, vector<256x128xf32>
    %c0_2 = arith.constant 0 : index
    %c0_3 = arith.constant 0 : index
    %4 = vector.load %arg3[%c0_2, %c0_3] : memref<256x1152xbf16, #tpu.memory_space<vmem>>, vector<256x1152xbf16>
    %c0_4 = arith.constant 0 : index
    %c0_5 = arith.constant 0 : index
    %5 = vector.load %arg4[%c0_4, %c0_5] : memref<1152x128xbf16, #tpu.memory_space<vmem>>, vector<1152x128xbf16>
    %cst = arith.constant dense<0.000000e+00> : vector<256x128xf32>
    %6 = tpu.matmul %4, %5, %cst {dimension_numbers = #tpu.dot_dimension_numbers<[1], [0], [0], [1], [0, 0, 1, 1], [], []>} : vector<256x1152xbf16>, vector<1152x128xbf16>, vector<256x128xf32> -> vector<256x128xf32>
    %7 = arith.addf %3, %6 : vector<256x128xf32>
    %c0_6 = arith.constant 0 : index
    %c0_7 = arith.constant 0 : index
    %8 = vector.load %arg8[%c0_6, %c0_7] : memref<256x128xf32, #tpu.memory_space<vmem>>, vector<256x128xf32>
    tpu.vector_store %arg8[%c0_6, %c0_7], %7 {strides = array<i32>} : memref<256x128xf32, #tpu.memory_space<vmem>>, vector<256x128xf32>,
    %c0_i32_8 = arith.constant 0 : i32
    %9 = arith.cmpi eq, %arg2, %c0_i32_8 : i32
    %10 = arith.extui %9 : i1 to i32
    %c0_i32_9 = arith.constant 0 : i32
    %11 = arith.cmpi ne, %10, %c0_i32_9 : i32
    scf.if %11 {
      %c0_10 = arith.constant 0 : index
      %c0_11 = arith.constant 0 : index
      %12 = vector.load %arg8[%c0_10, %c0_11] : memref<256x128xf32, #tpu.memory_space<vmem>>, vector<256x128xf32>
      %c0_12 = arith.constant 0 : index
      %c0_13 = arith.constant 0 : index
      %13 = vector.load %arg5[%c0_12, %c0_13] : memref<1x128xf32, #tpu.memory_space<vmem>>, vector<1x128xf32>
      %14 = vector.broadcast %13 : vector<1x128xf32> to vector<256x128xf32>
      %15 = arith.mulf %12, %14 : vector<256x128xf32>
      %c0_14 = arith.constant 0 : index
      %c0_15 = arith.constant 0 : index
      %16 = vector.load %arg6[%c0_14, %c0_15] : memref<1x128xf32, #tpu.memory_space<vmem>>, vector<1x128xf32>
      %17 = vector.broadcast %16 : vector<1x128xf32> to vector<256x128xf32>
      %18 = arith.addf %15, %17 : vector<256x128xf32>
      %cst_16 = arith.constant 0.000000e+00 : f32
      %19 = vector.broadcast %cst_16 : f32 to vector<256x128xf32>
      %20 = arith.maximumf %18, %19 : vector<256x128xf32>
      %21 = arith.truncf %20 : vector<256x128xf32> to vector<256x128xbf16>
      %c0_17 = arith.constant 0 : index
      %c0_18 = arith.constant 0 : index
      %22 = vector.load %arg7[%c0_17, %c0_18] : memref<256x128xbf16, #tpu.memory_space<vmem>>, vector<256x128xbf16>
      tpu.vector_store %arg7[%c0_17, %c0_18], %21 {strides = array<i32>} : memref<256x128xbf16, #tpu.memory_space<vmem>>, vector<256x128xbf16>,
    } else {
    }
    return
  }
  func.func @transform_0(%arg0: i32, %arg1: i32, %arg2: i32) -> (i32, i32) {
    %c0_i32 = arith.constant 0 : i32
    return %arg0, %arg2 : i32, i32
  }
  func.func @transform_1(%arg0: i32, %arg1: i32, %arg2: i32) -> (i32, i32) {
    %c0_i32 = arith.constant 0 : i32
    return %arg2, %arg1 : i32, i32
  }
  func.func @transform_2(%arg0: i32, %arg1: i32, %arg2: i32) -> (i32, i32) {
    %c0_i32 = arith.constant 0 : i32
    %c0_i32_0 = arith.constant 0 : i32
    return %c0_i32, %arg1 : i32, i32
  }
  func.func @transform_3(%arg0: i32, %arg1: i32, %arg2: i32) -> (i32, i32) {
    %c0_i32 = arith.constant 0 : i32
    %c0_i32_0 = arith.constant 0 : i32
    return %c0_i32, %arg1 : i32, i32
  }
  func.func @transform_4(%arg0: i32, %arg1: i32, %arg2: i32) -> (i32, i32) {
    %c0_i32 = arith.constant 0 : i32
    return %arg0, %arg1 : i32, i32
  }
}

</mosaic_0001>

<bundles_post_ra>
// kernel: tpu_custom_call.1
= control target key start
LH: loop header
LB: loop body
LE: loop exit
PB: predicated region body
PF: predicated region fallthrough
CT: control target
= control target key end

     0   :  { %9 = vsyncpa [#allocation4], 0  ;;  %s5577_s0 = inlined_call_operand.hbm [shape: bf16[512,1152], index: 0, kind: input, shape index: {}]   ;;  %s5578_s1 = inlined_call_operand.hbm [shape: bf16[1152,128], index: 1, kind: input, shape index: {}]   ;;  %s5579_s2 = inlined_call_operand.hbm [shape: f32[1,128], index: 2, kind: input, shape index: {}]   ;;  %s5580_s3 = inlined_call_operand.hbm [shape: f32[1,128], index: 3, kind: input, shape index: {}]   ;;  %s5581_s4 = inlined_call_operand.hbm [shape: bf16[512,128], index: 4, kind: output, shape index: {}]  }
   0x1   :  { %11 = vsyncpa [#allocation4 + $0x1], 0 }
   0x2   :  { %12 = vsyncpa [#allocation7], 0 }
   0x3   :  { %13 = vsyncpa [#allocation10], 0 }
   0x4   :  { %14 = vsyncpa [#allocation5], 0 }
   0x5   :  { %16 = vsyncpa [#allocation5 + $0x1], 0  ;;  %s4725_s15 = smov 0   ;;  %s4727_s16 = smov 0  }
   0x6   :  { %s4729_s17 = smov 0   ;;  %s4731_s18 = smov 0  }
   0x7   :  { %s4733_s19 = smov 0   ;;  %s4735_s20 = smov 0  }
   0x8 LB: > { %s3167_s21 = sadd.s32 4294967295, %s4687_s20   ;;  %s3168_s22 = sadd.s32 4294967294, %s4687_s20   ;;  %s4687_s20 = sphi %s4735_s20, %s22_s20   ;;  %s4683_s19 = sphi %s4733_s19, %s5608_s19   ;;  %s4679_s18 = sphi %s4731_s18, %s5607_s18   ;;  %s4675_s17 = sphi %s4729_s17, %s5606_s17   ;;  %s4671_s16 = sphi %s4727_s16, %s5605_s16   ;;  %s4667_s15 = sphi %s4725_s15, %s5604_s15  }
   0x9   : > { %p63_p0 = scmp.ne.s32.totalorder %s4671_s16, %s4667_s15  ;;  %p4759_p1 = scmp.eq.s32.totalorder %s3167_s21, 0 }
   0xa   : > { %p4763_p2 = scmp.eq.s32.totalorder %s3167_s21, 1  ;;  %p175_p3 = scmp.eq.s32.totalorder %s3168_s22, 1 }
   0xb   : > { %s5587_s23 = scalar_select %p4759_p1, 1, 0 }
   0xc   : > { %s5588_s24 = scalar_select %p4763_p2, 1, 0 }
   0xd   : > { %p4769_p4 = por %p4759_p1, %p63_p0  ;;  %p3169_p5 = scmp.ge.s32.totalorder %s4687_s20, 1 }
   0xe   : > { %p4774_p6 = por %p175_p3, %p63_p0  ;;  %p182_p7 = scmp.lt.s32.totalorder %s4687_s20, 3 }
   0xf   : > { %s5589_s25 = scalar_select %p4769_p4, 1, 0 }
  0x10   : > { %s5590_s26 = scalar_select %p4774_p6, 1, 0 }
  0x11   : > { %p4779_p8 = pnand %p3169_p5, %p182_p7  ;;  %s4689_s28 = smov [#allocation6]  }
  0x12   : > { %5591 = sst [smem:[#allocation16_spill]] %s5590_s26  ;;  %s198_s29 = sshll.u32 %s4689_s28, 4  ;;  %s4783_s29 = int_to_ptr.vmem [resolvable:$true] %s198_s29 }
  0x13   : > { %s5592_s27 = scalar_select %p4779_p8, 1, 0 }
  0x14   : > { %p4120_p9 = pneg %p4779_p8  ;;  %s4690_s5 = smov [#allocation8]  }
  0x15   : > { %s214_s6 = sshll.u32 %s4690_s5, 4  ;;  %s4691_s7 = smov [#allocation9]   ;;  %s4794_s6 = int_to_ptr.vmem [resolvable:$true] %s214_s6 }
  0x16   : > { %p4790_p11 = pnand %p4120_p9, %p4759_p1  ;;  %s4796_s8 = sshll.u32 %s4691_s7, 4  ;;  %s228_s8 = int_to_ptr.vmem [resolvable:$true] %s4796_s8 }
  0x17   : > { %s4483_s11 = scalar_lea.hbm %s5578_s1, 9216 }
  0x18   : > { %p4484_p12 = scmp.ne.s32.totalorder %s5578_s1, %s4483_s11  ;;  %p4806_p13 = pneg %p4790_p11 }
  0x19   : > { %p4490_p5 = scmp.lt.u32.totalorder %s4483_s11, %s5578_s1 }
  0x1a   : > { %p4486_p0 = pnand %p4806_p13, %p4484_p12 }
  0x1c   : > { %p4487_p3 = pneg %p4486_p0 }
  0x1e   : > { %p4492_p7 = pnand %p4490_p5, %p4487_p3 }
  0x20   : > { %4495 = shalt.err (!%p4492_p7)
}
  0x21   : > { %s4496_s28 = scalar_lea.vmem %s4783_s29, 9216  ;;  %p4504_p1 = scmp.lt.s32.totalorder %s4783_s29, %s4783_s29 }
  0x22   : > { %p4497_p9 = scmp.ne.s32.totalorder %s4783_s29, %s4496_s28  ;;  %p4505_p4 = scmp.lt.s32.totalorder %s4496_s28, %s4496_s28 }
  0x24   : > { %p4499_p10 = pnand %p4497_p9, %p4806_p13  ;;  %p4506_p12 = por %p4505_p4, %p4504_p1 }
  0x26   : > { %p4500_p6 = pneg %p4499_p10 }
  0x28   : > { %p4507_p0 = pnand %p4506_p12, %p4500_p6 }
  0x2a   : > { %4510 = shalt.err (!%p4507_p0)
}
  0x2b   : > { %s4692_s5 = smov 64   ;;  %s4693_s7 = smov 4  }
  0x2c   : > { %4123 = dma.hbm_to_vmem [thread:$0]  (!%p4790_p11), %s5578_s1, 9216, %s4783_s29, [#allocation7], %s4692_s5, %s4692_s5, %s4693_s7  }
  0x2d   : > { %s4511_s13 = scalar_lea.hbm %s5579_s2, 16 }
  0x2e   : > { %p4512_p1 = scmp.ne.s32.totalorder %s5579_s2, %s4511_s13  ;;  %p4518_p10 = scmp.lt.u32.totalorder %s4511_s13, %s5579_s2 }
  0x30   : > { %p4514_p4 = pnand %p4512_p1, %p4806_p13 }
  0x32   : > { %p4515_p6 = pneg %p4514_p4 }
  0x34   : > { %p4520_p3 = pnand %p4518_p10, %p4515_p6 }
  0x36   : > { %4523 = shalt.err (!%p4520_p3)
}
  0x37   : > { %s4524_s29 = scalar_lea.vmem %s4794_s6, 16  ;;  %s4531_s5 = scalar_lea.vmem %s4794_s6, 32 }
  0x38   : > { %p4525_p5 = scmp.ne.s32.totalorder %s4794_s6, %s4524_s29  ;;  %p4532_p12 = scmp.lt.s32.totalorder %s4794_s6, %s4794_s6 }
  0x39   : > { %p4533_p0 = scmp.lt.s32.totalorder %s4531_s5, %s4524_s29 }
  0x3a   : > { %p4527_p7 = pnand %p4525_p5, %p4806_p13 }
  0x3b   : > { %p4534_p1 = por %p4533_p0, %p4532_p12 }
  0x3c   : > { %p4528_p9 = pneg %p4527_p7 }
  0x3e   : > { %p4535_p4 = pnand %p4534_p1, %p4528_p9 }
  0x40   : > { %4538 = shalt.err (!%p4535_p4)
}
  0x41   : > { %4126 = dma.hbm_to_vmem [thread:$0]  (!%p4790_p11), %s5579_s2, 16, %s4794_s6, [#allocation7]  }
  0x42   : > { %s4539_s11 = scalar_lea.hbm %s5580_s3, 16 }
  0x43   : > { %p4540_p6 = scmp.ne.s32.totalorder %s5580_s3, %s4539_s11  ;;  %p4546_p5 = scmp.lt.u32.totalorder %s4539_s11, %s5580_s3 }
  0x45   : > { %p4542_p10 = pnand %p4540_p6, %p4806_p13 }
  0x47   : > { %p4543_p3 = pneg %p4542_p10 }
  0x49   : > { %p4548_p7 = pnand %p4546_p5, %p4543_p3 }
  0x4b   : > { %4551 = shalt.err (!%p4548_p7)
}
  0x4c   : > { %s4552_s28 = scalar_lea.vmem %s228_s8, 16  ;;  %s4559_s6 = scalar_lea.vmem %s228_s8, 32 }
  0x4d   : > { %p4553_p9 = scmp.ne.s32.totalorder %s228_s8, %s4552_s28  ;;  %p4560_p1 = scmp.lt.s32.totalorder %s228_s8, %s228_s8 }
  0x4e   : > { %p4561_p4 = scmp.lt.s32.totalorder %s4559_s6, %s4552_s28 }
  0x4f   : > { %p4555_p12 = pnand %p4553_p9, %p4806_p13 }
  0x50   : > { %p4562_p8 = por %p4561_p4, %p4560_p1 }
  0x51   : > { %p4556_p0 = pneg %p4555_p12 }
  0x53   : > { %p4563_p2 = pnand %p4562_p8, %p4556_p0 }
  0x55   : > { %4566 = shalt.err (!%p4563_p2)
}
  0x56   : > { %4129 = dma.hbm_to_vmem [thread:$0]  (!%p4790_p11), %s5580_s3, 16, %s228_s8, [#allocation10]  }
  0x57   : > { %s50_s14 = sadd.s32 1, %s4675_s17  ;;  %s41_s26 = sadd.s32 1, %s4683_s19 }
  0x58   : > { %p57_p2 = scmp.ne.s32.totalorder %s4675_s17, %s4671_s16  ;;  %p43_p8 = scmp.ge.s32.totalorder %s41_s26, 2 }
  0x59   : > { %p58_p13 = scmp.eq.s32.totalorder %s4687_s20, 0  ;;  %p5595_p6 = scmp.ne.s32.totalorder %s5588_s24, 0 }
  0x5a   : > { %p4141_p3 = scmp.lt.s32.totalorder %s4687_s20, 2  ;;  %s5610_s26 = smov (%p43_p8, %s41_s26), 0 }
  0x5b   : > { %p4877_p10 = por %p5595_p6, %p57_p2  ;;  %p59_p5 = por %p58_p13, %p57_p2 }
  0x5c   : > { %s238_s7 = sand.u32 1, %s4675_s17   ;;  %s45_s9 = ssub.s32 %s4683_s19, %s5610_s26 }
  0x5d   : > { %p48_p7 = scmp.eq.s32.totalorder %s45_s9, 0  ;;  %s4101_s8 = smul.u32 1152, %s238_s7 }
  0x5e   : > { %s4102_s10 = smul.u32 18432, %s4683_s19  ;;  %p4888_p11 = pnand %p4141_p3, %p59_p5 }
  0x5f   : > { %s4893_s24 = scalar_select %p48_p7, %s4675_s17, %s50_s14  }
  0x60   : > { %s4898_s21 = scalar_lea.hbm %s5577_s0, %s4102_s10  ;;  %s242_s22 = scalar_lea.vmem [#allocation3], %s4101_s8 }
  0x61   : > { %s252_s28 = sshll.u32 %s242_s22, 4  ;;  %s4902_s6 = scalar_lea.sflag [#allocation4], %s238_s7  ;;  %s4900_s28 = int_to_ptr.vmem [resolvable:$true] %s252_s28 }
  0x62   : > { %s4567_s29 = scalar_lea.hbm %s4898_s21, 18432  ;;  %p4569_p12 = pneg %p4888_p11 }
  0x63   : > { %p4568_p9 = scmp.ne.s32.totalorder %s4898_s21, %s4567_s29  ;;  %s4572_s9 = scalar_lea.hbm %s5577_s0, 36864 }
  0x64   : > { %p4573_p4 = scmp.lt.u32.totalorder %s4898_s21, %s5577_s0  ;;  %p4574_p2 = scmp.lt.u32.totalorder %s4572_s9, %s4567_s29 }
  0x65   : > { %p4570_p0 = pnand %p4569_p12, %p4568_p9  ;;  %p4576_p13 = scmp.lt.u32.totalorder %s4567_s29, %s4898_s21 }
  0x66   : > { %p4575_p8 = por %p4574_p2, %p4573_p4 }
  0x67   : > { %p4571_p1 = pneg %p4570_p0 }
  0x68   : > { %p4577_p6 = por %p4576_p13, %p4575_p8 }
  0x6a   : > { %p4578_p3 = pnand %p4577_p6, %p4571_p1 }
  0x6c   : > { %4581 = shalt.err (!%p4578_p3)
}
  0x6d   : > { %s4582_s7 = scalar_lea.vmem %s4900_s28, 18432  ;;  %s4694_s8 = smov [#allocation3]  }
  0x6e   : > { %p4583_p5 = scmp.ne.s32.totalorder %s4900_s28, %s4582_s7  ;;  %s4587_s13 = sshll.u32 %s4694_s8, 4  ;;  %s4588_s13 = int_to_ptr.vmem [resolvable:$false] %s4587_s13 }
  0x6f   : > { %s4589_s22 = scalar_lea.vmem %s4588_s13, 36864  ;;  %p4590_p0 = scmp.lt.s32.totalorder %s4900_s28, %s4588_s13 }
  0x70   : > { %p4585_p7 = pnand %p4583_p5, %p4569_p12  ;;  %p4591_p4 = scmp.lt.s32.totalorder %s4589_s22, %s4582_s7 }
  0x72   : > { %p4586_p9 = pneg %p4585_p7  ;;  %p4592_p2 = por %p4591_p4, %p4590_p0 }
  0x74   : > { %p4593_p8 = pnand %p4592_p2, %p4586_p9 }
  0x76   : > { %4596 = shalt.err (!%p4593_p8)
}
  0x77   : > { %s4695_s29 = smov 576   ;;  %s4696_s5 = smov 36  }
  0x78   : > { %4133 = dma.hbm_to_vmem [thread:$0]  (!%p4888_p11), %s4898_s21, 18432, %s4900_s28, %s4902_s6, %s4695_s29, %s4695_s29, %s4696_s5  }
  0x79   : > { %p5598_p12 = scmp.ne.s32.totalorder %s5592_s27, 0 }
  0x7a   : > { %s4933_s14 = sand.u32 (!%p5598_p12), 1, %s4671_s16   ;;  %p5599_p1 = scmp.ne.s32.totalorder (!%p5598_p12), %s5589_s25, 0 }
  0x7b   : > { %264 = sbr.rel (%p5598_p12) target bundleno = 693 (0x2b5), region = 36  ;;  %s267_s10 = scalar_lea.sflag (!%p5598_p12), [#allocation4], %s4933_s14 }
  0x7c   : > { %s4103_s9 = smul.u32 (!%p5598_p12), 1152, %s4933_s14 }
  0x7e   : > { %s4937_s12 = scalar_lea.vmem (!%p5598_p12), [#allocation3], %s4103_s9 }
  0x82   : > { %4650 = dma.done.wait (%p5599_p1), %s267_s10, 18432  }
  0x83   : > { %4652 = vsyncadd (%p5599_p1), %s267_s10, 4294948864  ;;  %p5600_p11 = scmp.ne.s32.totalorder %s5587_s23, 0 }
  0x85   : > { %4654 = dma.done.wait (%p5600_p11), [#allocation7], 9232  }
  0x86   : > { %4656 = vsyncadd (%p5600_p11), [#allocation7], 4294958064 }
  0x87   : > { %4658 = dma.done.wait (%p5600_p11), [#allocation10], 16  }
  0x88   : > { %4660 = vsyncadd (%p5600_p11), [#allocation10], 4294967280  ;;  %v4203_v0 = vld [vmem:[#allocation6 + $0x40] sm:$0xff]   ;;  %v4205_v2 = vld [vmem:[#allocation6 + $0x48] sm:$0xff]   ;;  %s3181_s23 = sshll.u32 %s4933_s14, 7  ;;  %s3469_s27 = sshll.u32 %s4679_s18, 11 }
  0x89   : > { %v4204_v1 = vld [vmem:[#allocation6] sm:$0xff]   ;;  %3565 = vmatprep.subr.bf16.mxu0 %v4203_v0  ;;  %4085 = vmatprep.subr.bf16.mxu1 %v4203_v0  ;;  %v4206_v3 = vld [vmem:[#allocation6 + $0x8] sm:$0xff]   ;;  %v4207_v4 = vld [vmem:[#allocation6 + $0x50] sm:$0xff]   ;;  %s5413_s25 = scalar_lea.vmem [#allocation11], %s3181_s23  ;;  %s5525_s6 = scalar_lea.hbm %s5581_s4, %s3469_s27 }
  0x8a   : > { %3566 = vmatpush3.bf16.msra.mxu0 %v4204_v1  ;;  %4093 = vmatpush3.bf16.msra.mxu1 %v4204_v1  ;;  %v4208_v5 = vld [vmem:[#allocation6 + $0x10] sm:$0xff]   ;;  %v4209_v6 = vld [vmem:[#allocation6 + $0x58] sm:$0xff]   ;;  %v4211_v8 = vld [vmem:[#allocation6 + $0x60] sm:$0xff]   ;;  %s3041_s11 = sshll.u32 %s5413_s25, 4  ;;  %s3027_s7 = scalar_lea.sflag [#allocation5], %s4933_s14  ;;  %s5527_s11 = int_to_ptr.vmem [resolvable:$true] %s3041_s11 }
  0x8b   : > { %3567 = vmatprep.subr.bf16.mxu0 %v4205_v2  ;;  %4086 = vmatprep.subr.bf16.mxu1 %v4205_v2  ;;  %v4210_v7 = vld [vmem:[#allocation6 + $0x18] sm:$0xff]   ;;  %v4212_v9 = vld [vmem:[#allocation6 + $0x20] sm:$0xff]   ;;  %v4213_v10 = vld [vmem:[#allocation6 + $0x68] sm:$0xff]   ;;  %s4597_s8 = scalar_lea.vmem %s5527_s11, 2048  ;;  %s4697_s18 = smov [#allocation11]  }
  0x8c   : > { %v4221_v11 = vld [vmem:[%s4937_s12 + $0x4] ss:$36 sps:$4 sm:$0xff]   ;;  %v4215_v14 = vld [vmem:[#allocation6 + $0x70] sm:$0xff]   ;;  %v4217_v16 = vld [vmem:[#allocation6 + $0x78] sm:$0xff]   ;;  %p4598_p13 = scmp.ne.s32.totalorder %s5527_s11, %s4597_s8  ;;  %s4601_s13 = sshll.u32 %s4697_s18, 4  ;;  %s4602_s13 = int_to_ptr.vmem [resolvable:$false] %s4601_s13 }
  0x8d   : > { %v4224_v12 = vld [vmem:[%s4937_s12 + $0x364] ss:$36 sps:$4 sm:$0xff]   ;;  %1884 = vmatprep.mubr.bf16.mxu0 %v4221_v11  ;;  %v4216_v15 = vld [vmem:[#allocation6 + $0x30] sm:$0xff]   ;;  %v4218_v17 = vld [vmem:[#allocation6 + $0x38] sm:$0xff]   ;;  %s4603_s22 = scalar_lea.vmem %s4602_s13, 4096  ;;  %p4604_p5 = scmp.lt.s32.totalorder %s5527_s11, %s4602_s13 }
  0x8e   : > { %3568 = vmatpush3.bf16.msra.mxu0 %v4206_v3  ;;  %4094 = vmatpush3.bf16.msra.mxu1 %v4206_v3  ;;  %v4214_v13 = vld [vmem:[#allocation6 + $0x28] sm:$0xff]   ;;  %v4225_v18 = vld [vmem:[#allocation6 + $0xc0] sm:$0xff]   ;;  %v4237_v31 = vld [vmem:[#allocation6 + $0xd0] sm:$0xff]   ;;  %p4599_p6 = pnand %p4598_p13, %p4877_p10  ;;  %p4605_p7 = scmp.lt.s32.totalorder %s4603_s22, %s4597_s8 }
  0x8f   : > { %3569 = vmatprep.subr.bf16.mxu0 %v4207_v4  ;;  %4087 = vmatprep.subr.bf16.mxu1 %v4207_v4  ;;  %v4219_v19 = vld [vmem:[%s4937_s12] ss:$36 sps:$4 sm:$0xff]   ;;  %v4227_v23 = vld [vmem:[#allocation6 + $0xc8] sm:$0xff]   ;;  %v4238_v32 = vld [vmem:[#allocation6 + $0x90] sm:$0xff]  }
  0x90   : > { %1980 = vmatprep.mubr.bf16.mxu1 %v4224_v12  ;;  %v4222_v20 = vld [vmem:[%s4937_s12 + $0x360] ss:$36 sps:$4 sm:$0xff]   ;;  %v4231_v25 = vld [vmem:[%s4937_s12 + $0x4c] ss:$36 sps:$4 sm:$0xff]   ;;  %v4239_v34 = vld [vmem:[#allocation6 + $0xd8] sm:$0xff]   ;;  %p4600_p3 = pneg %p4599_p6  ;;  %p4606_p9 = por %p4605_p7, %p4604_p5 }
  0x91   : > { %v4228_v21 = vld [vmem:[#allocation6 + $0x140] sm:$0xff]   ;;  %v4233_v26 = vld [vmem:[%s4937_s12 + $0x3ac] ss:$36 sps:$4 sm:$0xff]   ;;  %v4241_v35 = vld [vmem:[%s4937_s12 + $0x94] ss:$36 sps:$4 sm:$0xff]  }
  0x92   : > { %3570 = vmatpush3.bf16.msra.mxu0 %v4208_v5  ;;  %4095 = vmatpush3.bf16.msra.mxu1 %v4208_v5  ;;  %v4226_v22 = vld [vmem:[#allocation6 + $0x80] sm:$0xff]   ;;  %v4229_v27 = vld [vmem:[#allocation6 + $0x88] sm:$0xff]   ;;  %v4243_v36 = vld [vmem:[%s4937_s12 + $0x3f4] ss:$36 sps:$4 sm:$0xff]   ;;  %p4607_p0 = pnand %p4606_p9, %p4600_p3 }
  0x93   : > { %3571 = vmatprep.subr.bf16.mxu0 %v4209_v6  ;;  %4088 = vmatprep.subr.bf16.mxu1 %v4209_v6  ;;  %v4230_v24 = vld [vmem:[#allocation6 + $0x100] sm:$0xff]   ;;  %v4248_v28 = vld [vmem:[#allocation6 + $0x148] sm:$0xff]   ;;  %v4240_v37 = vld [vmem:[#allocation6 + $0x98] sm:$0xff]  }
  0x94   : > { %v4235_v29 = vld [vmem:[%s4937_s12 + $0x48] ss:$36 sps:$4 sm:$0xff]   ;;  %v4245_v38 = vld [vmem:[%s4937_s12 + $0x90] ss:$36 sps:$4 sm:$0xff]   ;;  %v4247_v40 = vld [vmem:[#allocation6 + $0xe0] sm:$0xff]  }
  0x95   : > { %v4236_v30 = vld [vmem:[%s4937_s12 + $0x3a8] ss:$36 sps:$4 sm:$0xff]   ;;  %v4246_v39 = vld [vmem:[%s4937_s12 + $0x3f0] ss:$36 sps:$4 sm:$0xff]   ;;  %v4249_v41 = vld [vmem:[#allocation6 + $0xa0] sm:$0xff]  }
  0x96   : > { %3572 = vmatpush3.bf16.msra.mxu0 %v4210_v7  ;;  %4096 = vmatpush3.bf16.msra.mxu1 %v4210_v7  ;;  %v4250_v33 = vld [vmem:[#allocation6 + $0x108] sm:$0xff]   ;;  %v4262_v43 = vld [vmem:[#allocation6 + $0x150] sm:$0xff]   ;;  %v4253_v44 = vld [vmem:[%s4937_s12 + $0xdc] ss:$36 sps:$4 sm:$0xff]  }
  0x97   : > { %3573 = vmatprep.subr.bf16.mxu0 %v4211_v8  ;;  %4089 = vmatprep.subr.bf16.mxu1 %v4211_v8  ;;  %v4251_v42 = vld [vmem:[#allocation6 + $0xe8] sm:$0xff]   ;;  %v4255_v45 = vld [vmem:[%s4937_s12 + $0x43c] ss:$36 sps:$4 sm:$0xff]   ;;  %v4264_v46 = vld [vmem:[#allocation6 + $0x110] sm:$0xff]  }
  0x98   : > { %v4252_v47 = vld [vmem:[#allocation6 + $0xa8] sm:$0xff]   ;;  %v4259_v48 = vld [vmem:[#allocation6 + $0xf0] sm:$0xff]   ;;  %v4257_v49 = vld [vmem:[%s4937_s12 + $0xd8] ss:$36 sps:$4 sm:$0xff]  }
  0x99   : > { %v4258_v50 = vld [vmem:[%s4937_s12 + $0x438] ss:$36 sps:$4 sm:$0xff]   ;;  %v4260_v51 = vld [vmem:[#allocation6 + $0xb0] sm:$0xff]   ;;  %v4265_v53 = vld [vmem:[%s4937_s12 + $0x124] ss:$36 sps:$4 sm:$0xff]  }
  0x9a   : > { %3574 = vmatpush3.bf16.msra.mxu0 %v4212_v9  ;;  %4097 = vmatpush3.bf16.msra.mxu1 %v4212_v9  ;;  %v4261_v52 = vld [vmem:[#allocation6 + $0xf8] sm:$0xff]   ;;  %v4269_v54 = vld [vmem:[%s4937_s12 + $0xc] ss:$36 sps:$4 sm:$0xff]   ;;  %v4270_v59 = vld [vmem:[%s4937_s12 + $0x120] ss:$36 sps:$4 sm:$0xff]  }
  0x9b   : > { %3575 = vmatprep.subr.bf16.mxu0 %v4213_v10  ;;  %4090 = vmatprep.subr.bf16.mxu1 %v4213_v10  ;;  %v4279_v55 = vld [vmem:[#allocation6 + $0x158] sm:$0xff]   ;;  %v4267_v58 = vld [vmem:[%s4937_s12 + $0x8] ss:$36 sps:$4 sm:$0xff]   ;;  %v4271_v60 = vld [vmem:[#allocation6 + $0x1c0] sm:$0xff]  }
  0x9c   : > { %v4280_v56 = vld [vmem:[#allocation6 + $0x118] sm:$0xff]   ;;  %v4272_v61 = vld [vmem:[#allocation6 + $0x180] sm:$0xff]   ;;  %v4273_v62 = vld [vmem:[%s4937_s12 + $0x16c] ss:$36 sps:$4 sm:$0xff]  }
  0x9d   : > { %v4263_v57 = vld [vmem:[#allocation6 + $0xb8] sm:$0xff]   ;;  %v4289_v0 = vld [vmem:[#allocation6 + $0x160] sm:$0xff]   ;;  %v4287_v1 = vld [vmem:[#allocation6 + $0x1c8] sm:$0xff]  }
  0x9e   : > { %3576 = vmatpush3.bf16.msra.mxu0 %v4214_v13  ;;  %4098 = vmatpush3.bf16.msra.mxu1 %v4214_v13  ;;  %v4275_v63 = vld [vmem:[%s4937_s12 + $0x54] ss:$36 sps:$4 sm:$0xff]   ;;  %v4290_v2 = vld [vmem:[#allocation6 + $0x120] sm:$0xff]   ;;  %v4288_v3 = vld [vmem:[#allocation6 + $0x188] sm:$0xff]  }
  0x9f   : > { %3577 = vmatprep.subr.bf16.mxu0 %v4215_v14  ;;  %4091 = vmatprep.subr.bf16.mxu1 %v4215_v14  ;;  %v4277_v4 = vld [vmem:[%s4937_s12 + $0x168] ss:$36 sps:$4 sm:$0xff]   ;;  %v4278_v5 = vld [vmem:[%s4937_s12 + $0x50] ss:$36 sps:$4 sm:$0xff]   ;;  %v4283_v7 = vld [vmem:[%s4937_s12 + $0x9c] ss:$36 sps:$4 sm:$0xff]  }
  0xa0   : > { %v4281_v6 = vld [vmem:[%s4937_s12 + $0x1b4] ss:$36 sps:$4 sm:$0xff]   ;;  %v4303_v8 = vld [vmem:[#allocation6 + $0x168] sm:$0xff]   ;;  %v4291_v14 = vld [vmem:[%s4937_s12 + $0x1fc] ss:$36 sps:$4 sm:$0xff]  }
  0xa1   : > { %v4304_v9 = vld [vmem:[#allocation6 + $0x1d0] sm:$0xff]   ;;  %v4305_v10 = vld [vmem:[#allocation6 + $0x128] sm:$0xff]   ;;  %v4286_v13 = vld [vmem:[%s4937_s12 + $0x98] ss:$36 sps:$4 sm:$0xff]  }
  0xa2   : > { %3578 = vmatpush3.bf16.msra.mxu0 %v4216_v15  ;;  %4099 = vmatpush3.bf16.msra.mxu1 %v4216_v15  ;;  %v4306_v11 = vld [vmem:[#allocation6 + $0x190] sm:$0xff]  }
  0xa3   : > { %3579 = vmatprep.subr.bf16.mxu0 %v4217_v16  ;;  %4092 = vmatprep.subr.bf16.mxu1 %v4217_v16  ;;  %v4285_v12 = vld [vmem:[%s4937_s12 + $0x1b0] ss:$36 sps:$4 sm:$0xff]  }
  0xa4   : > { %v4313_v15 = vld [vmem:[#allocation6 + $0x170] sm:$0xff]  }
  0xa5   : > { %v4314_v16 = vld [vmem:[#allocation6 + $0x130] sm:$0xff]  }
  0xa6   : > { %3580 = vmatpush3.bf16.msra.mxu0 %v4218_v17  ;;  %4100 = vmatpush3.bf16.msra.mxu1 %v4218_v17  ;;  %v4293_v17 = vld [vmem:[%s4937_s12 + $0xe4] ss:$36 sps:$4 sm:$0xff]  }
  0xa7   : > { %3677 = vmatprep.subr.bf16.mxu1 %v4225_v18  ;;  %3789 = vmatprep.subr.bf16.mxu0 %v4228_v21  ;;  %v4321_v18 = vld [vmem:[#allocation6 + $0x1d8] sm:$0xff]   ;;  %v4296_v21 = vld [vmem:[%s4937_s12 + $0xe0] ss:$36 sps:$4 sm:$0xff]  }
  0xa9   : > { %1885 = vmatmul.mubr.bf16.vlgmr.msra.gmra.mrb[0].mxu0 %v4219_v19  ;;  %1981 = vmatmul.mubr.bf16.vlgmr.msra.gmra.mrb[0].mxu1 %v4222_v20  ;;  %v4322_v19 = vld [vmem:[#allocation6 + $0x198] sm:$0xff]  }
  0xaa   : > { %3678 = vmatpush3.bf16.msra.mxu1 %v4226_v22  ;;  %3790 = vmatpush3.bf16.msra.mxu0 %v4230_v24  ;;  %v4295_v20 = vld [vmem:[%s4937_s12 + $0x1f8] ss:$36 sps:$4 sm:$0xff]   ;;  %v4297_v22 = vld [vmem:[%s4937_s12 + $0x244] ss:$36 sps:$4 sm:$0xff]  }
  0xab   : > { %3679 = vmatprep.subr.bf16.mxu1 %v4227_v23  ;;  %1892 = vmatprep.mubr.bf16.mxu0 %v4231_v25  ;;  %v4299_v23 = vld [vmem:[%s4937_s12 + $0x12c] ss:$36 sps:$4 sm:$0xff]   ;;  %v4329_v24 = vld [vmem:[#allocation6 + $0x178] sm:$0xff]  }
  0xac   : > { %1988 = vmatprep.mubr.bf16.mxu1 %v4233_v26  ;;  %3791 = vmatprep.subr.bf16.mxu0 %v4248_v28  ;;  %v4330_v25 = vld [vmem:[#allocation6 + $0x138] sm:$0xff]   ;;  %v4337_v26 = vld [vmem:[#allocation6 + $0x1e0] sm:$0xff]  }
  0xad   : > { %v4338_v28 = vld [vmem:[#allocation6 + $0x1a0] sm:$0xff]  }
  0xae   : > { %3680 = vmatpush3.bf16.msra.mxu1 %v4229_v27  ;;  %3792 = vmatpush3.bf16.msra.mxu0 %v4250_v33  ;;  %v4301_v27 = vld [vmem:[%s4937_s12 + $0x240] ss:$36 sps:$4 sm:$0xff]   ;;  %v4352_v33 = vld [vmem:[#allocation6 + $0x1e8] sm:$0xff]  }
  0xaf   : > { %3681 = vmatprep.subr.bf16.mxu1 %v4237_v31  ;;  %3793 = vmatprep.subr.bf16.mxu0 %v4262_v43  ;;  %v4307_v31 = vld [vmem:[%s4937_s12 + $0x28c] ss:$36 sps:$4 sm:$0xff]   ;;  %v4323_v43 = vld [vmem:[%s4937_s12 + $0x31c] ss:$36 sps:$4 sm:$0xff]  }
  0xb1   : > { %1893 = vmatmul.mubr.bf16.gmra.mrb[4].mxu0 %v4235_v29  ;;  %1989 = vmatmul.mubr.bf16.gmra.mrb[4].mxu1 %v4236_v30  ;;  %v4339_v29 = vld [vmem:[#allocation6 + $0x200] sm:$0xff]   ;;  %v4302_v30 = vld [vmem:[%s4937_s12 + $0x128] ss:$36 sps:$4 sm:$0xff]  }
  0xb2   : > { %3682 = vmatpush3.bf16.msra.mxu1 %v4238_v32  ;;  %1900 = vmatprep.mubr.bf16.mxu0 %v4241_v35  ;;  %v4309_v32 = vld [vmem:[%s4937_s12 + $0x174] ss:$36 sps:$4 sm:$0xff]   ;;  %v4353_v35 = vld [vmem:[#allocation6 + $0x1a8] sm:$0xff]  }
  0xb3   : > { %3683 = vmatprep.subr.bf16.mxu1 %v4239_v34  ;;  %1996 = vmatprep.mubr.bf16.mxu1 %v4243_v36  ;;  %v4311_v34 = vld [vmem:[%s4937_s12 + $0x288] ss:$36 sps:$4 sm:$0xff]   ;;  %v4312_v36 = vld [vmem:[%s4937_s12 + $0x170] ss:$36 sps:$4 sm:$0xff]  }
  0xb4   : > { %3794 = vmatpush3.bf16.msra.mxu0 %v4264_v46  ;;  %v4328_v46 = vld [vmem:[%s4937_s12 + $0x200] ss:$36 sps:$4 sm:$0xff]  }
  0xb5   : > { %3795 = vmatprep.subr.bf16.mxu0 %v4279_v55  ;;  %v4354_v55 = vld [vmem:[#allocation6 + $0x208] sm:$0xff]  }
  0xb6   : > { %3684 = vmatpush3.bf16.msra.mxu1 %v4240_v37  ;;  %v4315_v37 = vld [vmem:[%s4937_s12 + $0x2d4] ss:$36 sps:$4 sm:$0xff]  }
  0xb7   : > { %3685 = vmatprep.subr.bf16.mxu1 %v4247_v40  ;;  %v4320_v40 = vld [vmem:[%s4937_s12 + $0x1b8] ss:$36 sps:$4 sm:$0xff]  }
  0xb8   : > { %3796 = vmatpush3.bf16.msra.mxu0 %v4280_v56  ;;  %v4369_v56 = vld [vmem:[#allocation6 + $0x210] sm:$0xff]  }
  0xb9   : > { %1901 = vmatmul.mubr.bf16.gmra.mrb[8].mxu0 %v4245_v38  ;;  %1997 = vmatmul.mubr.bf16.gmra.mrb[8].mxu1 %v4246_v39  ;;  %v4317_v38 = vld [vmem:[%s4937_s12 + $0x1bc] ss:$36 sps:$4 sm:$0xff]   ;;  %v4319_v39 = vld [vmem:[%s4937_s12 + $0x2d0] ss:$36 sps:$4 sm:$0xff]  }
  0xba   : > { %3686 = vmatpush3.bf16.msra.mxu1 %v4249_v41  ;;  %1908 = vmatprep.mubr.bf16.mxu0 %v4253_v44  ;;  %v4367_v41 = vld [vmem:[#allocation6 + $0x1f0] sm:$0xff]   ;;  %v4325_v44 = vld [vmem:[%s4937_s12 + $0x204] ss:$36 sps:$4 sm:$0xff]  }
  0xbb   : > { %3687 = vmatprep.subr.bf16.mxu1 %v4251_v42  ;;  %2004 = vmatprep.mubr.bf16.mxu1 %v4255_v45  ;;  %v4368_v42 = vld [vmem:[#allocation6 + $0x1b0] sm:$0xff]   ;;  %v4327_v45 = vld [vmem:[%s4937_s12 + $0x318] ss:$36 sps:$4 sm:$0xff]  }
  0xbc   : > { %3797 = vmatprep.subr.bf16.mxu0 %v4289_v0  ;;  %v4351_v0 = vld [vmem:[%s4937_s12 + $0xa0] ss:$36 sps:$4 sm:$0xff]  }
  0xbd   : > { %3798 = vmatpush3.bf16.msra.mxu0 %v4290_v2  ;;  %v4357_v2 = vld [vmem:[%s4937_s12 + $0xec] ss:$36 sps:$4 sm:$0xff]  }
  0xbe   : > { %3688 = vmatpush3.bf16.msra.mxu1 %v4252_v47  ;;  %3799 = vmatprep.subr.bf16.mxu0 %v4303_v8  ;;  %v4382_v47 = vld [vmem:[#allocation6 + $0x1f8] sm:$0xff]  }
  0xbf   : > { %3689 = vmatprep.subr.bf16.mxu1 %v4259_v48  ;;  %v4383_v48 = vld [vmem:[#allocation6 + $0x1b8] sm:$0xff]  }
  0xc0   : > { %v4363_v8 = vld [vmem:[%s4937_s12 + $0x134] ss:$36 sps:$4 sm:$0xff]  }
  0xc1   : > { %1909 = vmatmul.mubr.bf16.gmra.mrb[12].mxu0 %v4257_v49  ;;  %2005 = vmatmul.mubr.bf16.gmra.mrb[12].mxu1 %v4258_v50  ;;  %v4331_v49 = vld [vmem:[%s4937_s12 + $0x24c] ss:$36 sps:$4 sm:$0xff]   ;;  %v4335_v50 = vld [vmem:[%s4937_s12 + $0x14] ss:$36 sps:$4 sm:$0xff]  }
  0xc2   : > { %3690 = vmatpush3.bf16.msra.mxu1 %v4260_v51  ;;  %1916 = vmatprep.mubr.bf16.mxu0 %v4265_v53  ;;  %v4333_v51 = vld [vmem:[%s4937_s12 + $0x10] ss:$36 sps:$4 sm:$0xff]  }
  0xc3   : > { %3691 = vmatprep.subr.bf16.mxu1 %v4261_v52  ;;  %2045 = vmatprep.mubr.bf16.mxu1 %v4269_v54  ;;  %v4336_v52 = vld [vmem:[%s4937_s12 + $0x248] ss:$36 sps:$4 sm:$0xff]   ;;  %v4340_v53 = vld [vmem:[%s4937_s12 + $0x294] ss:$36 sps:$4 sm:$0xff]   ;;  %v4342_v54 = vld [vmem:[%s4937_s12 + $0x5c] ss:$36 sps:$4 sm:$0xff]  }
  0xc4   : > { %3800 = vmatpush3.bf16.msra.mxu0 %v4305_v10  ;;  %v4365_v10 = vld [vmem:[%s4937_s12 + $0x368] ss:$36 sps:$4 sm:$0xff]  }
  0xc5   : > { %3801 = vmatprep.subr.bf16.mxu0 %v4313_v15  ;;  %v4375_v15 = vld [vmem:[%s4937_s12 + $0x178] ss:$36 sps:$4 sm:$0xff]  }
  0xc6   : > { %3692 = vmatpush3.bf16.msra.mxu1 %v4263_v57  ;;  %v4344_v57 = vld [vmem:[%s4937_s12 + $0x290] ss:$36 sps:$4 sm:$0xff]  }
  0xc7   : > { %3901 = vmatprep.subr.bf16.mxu1 %v4271_v60  ;;  %v4348_v60 = vld [vmem:[%s4937_s12 + $0xa4] ss:$36 sps:$4 sm:$0xff]  }
  0xc8   : > { %3802 = vmatpush3.bf16.msra.mxu0 %v4314_v16  ;;  %v4376_v16 = vld [vmem:[%s4937_s12 + $0x3fc] ss:$36 sps:$4 sm:$0xff]  }
  0xc9   : > { %1917 = vmatmul.mubr.bf16.gmra.mrb[16].mxu0 %v4270_v59  ;;  %2046 = vmatmul.mubr.bf16.vlgmr.msra.gmra.mrb[16].mxu1 %v4267_v58  ;;  %v4345_v58 = vld [vmem:[%s4937_s12 + $0x58] ss:$36 sps:$4 sm:$0xff]  }
  0xca   : > { %3902 = vmatpush3.bf16.msra.mxu1 %v4272_v61  ;;  %1924 = vmatprep.mubr.bf16.mxu0 %v4273_v62  ;;  %v4346_v59 = vld [vmem:[%s4937_s12 + $0x2dc] ss:$36 sps:$4 sm:$0xff]  }
  0xcb   : > { %2053 = vmatprep.mubr.bf16.mxu1 %v4275_v63  ;;  %3903 = vmatprep.subr.bf16.mxu1 %v4287_v1  ;;  %v4384_v61 = vld [vmem:[#allocation6 + $0x218] sm:$0xff]   ;;  %v4397_v62 = vld [vmem:[#allocation6 + $0x220] sm:$0xff]  }
  0xcc   : > { %3803 = vmatprep.subr.bf16.mxu0 %v4329_v24  ;;  %v4350_v63 = vld [vmem:[%s4937_s12 + $0x2d8] ss:$36 sps:$4 sm:$0xff]   ;;  %v4355_v1 = vld [vmem:[%s4937_s12 + $0x324] ss:$36 sps:$4 sm:$0xff]  }
  0xcd   : > { %3804 = vmatpush3.bf16.msra.mxu0 %v4330_v25  ;;  %v4391_v24 = vld [vmem:[%s4937_s12 + $0x254] ss:$36 sps:$4 sm:$0xff]   ;;  %v4395_v25 = vld [vmem:[%s4937_s12 + $0x1c] ss:$36 sps:$4 sm:$0xff]  }
  0xce   : > { %3904 = vmatpush3.bf16.msra.mxu1 %v4288_v3  ;;  %4037 = vmatprep.subr.bf16.mxu0 %v4339_v29  ;;  %v4410_v3 = vld [vmem:[#allocation6 + $0x228] sm:$0xff]  }
  0xcf   : > { %3905 = vmatprep.subr.bf16.mxu1 %v4304_v9  ;;  %v4436_v9 = vld [vmem:[#allocation6 + $0x238] sm:$0xff]  }
  0xd1   : > { %1925 = vmatmul.mubr.bf16.gmra.mrb[20].mxu0 %v4277_v4  ;;  %2054 = vmatmul.mubr.bf16.gmra.mrb[20].mxu1 %v4278_v5  ;;  %v4359_v4 = vld [vmem:[%s4937_s12 + $0x320] ss:$36 sps:$4 sm:$0xff]   ;;  %v4360_v5 = vld [vmem:[%s4937_s12 + $0xe8] ss:$36 sps:$4 sm:$0xff]  }
  0xd2   : > { %1932 = vmatprep.mubr.bf16.mxu0 %v4281_v6  ;;  %2061 = vmatprep.mubr.bf16.mxu1 %v4283_v7  ;;  %v4423_v6 = vld [vmem:[#allocation6 + $0x230] sm:$0xff]  }
  0xd3   : > { %3906 = vmatpush3.bf16.msra.mxu1 %v4306_v11  ;;  %v4361_v7 = vld [vmem:[%s4937_s12 + $0x36c] ss:$36 sps:$4 sm:$0xff]  }
  0xd4   : > { %3907 = vmatprep.subr.bf16.mxu1 %v4321_v18  ;;  %v4366_v11 = vld [vmem:[%s4937_s12 + $0x130] ss:$36 sps:$4 sm:$0xff]   ;;  %v4380_v18 = vld [vmem:[%s4937_s12 + $0x3f8] ss:$36 sps:$4 sm:$0xff]  }
  0xd7   : > { %3908 = vmatpush3.bf16.msra.mxu1 %v4322_v19  ;;  %v4381_v19 = vld [vmem:[%s4937_s12 + $0x1c0] ss:$36 sps:$4 sm:$0xff]  }
  0xd8   : > { %3909 = vmatprep.subr.bf16.mxu1 %v4337_v26  ;;  %v4393_v26 = vld [vmem:[%s4937_s12 + $0x18] ss:$36 sps:$4 sm:$0xff]  }
  0xd9   : > { %1933 = vmatmul.mubr.bf16.gmra.mrb[24].mxu0 %v4285_v12  ;;  %2062 = vmatmul.mubr.bf16.gmra.mrb[24].mxu1 %v4286_v13  ;;  %v4370_v12 = vld [vmem:[%s4937_s12 + $0x3b4] ss:$36 sps:$4 sm:$0xff]   ;;  %v4372_v13 = vld [vmem:[%s4937_s12 + $0x17c] ss:$36 sps:$4 sm:$0xff]  }
  0xda   : > { %1940 = vmatprep.mubr.bf16.mxu0 %v4291_v14  ;;  %2069 = vmatprep.mubr.bf16.mxu1 %v4293_v17  ;;  %v4374_v14 = vld [vmem:[%s4937_s12 + $0x3b0] ss:$36 sps:$4 sm:$0xff]   ;;  %v4378_v17 = vld [vmem:[%s4937_s12 + $0x1c4] ss:$36 sps:$4 sm:$0xff]  }
  0xdb   : > { %3910 = vmatpush3.bf16.msra.mxu1 %v4338_v28  ;;  %v4398_v28 = vld [vmem:[%s4937_s12 + $0x29c] ss:$36 sps:$4 sm:$0xff]  }
  0xdc   : > { %3911 = vmatprep.subr.bf16.mxu1 %v4352_v33  ;;  %v4406_v33 = vld [vmem:[%s4937_s12 + $0xac] ss:$36 sps:$4 sm:$0xff]  }
  0xdf   : > { %3912 = vmatpush3.bf16.msra.mxu1 %v4353_v35  ;;  %v4409_v35 = vld [vmem:[%s4937_s12 + $0xa8] ss:$36 sps:$4 sm:$0xff]  }
  0xe0   : > { %3913 = vmatprep.subr.bf16.mxu1 %v4367_v41  ;;  %v4419_v41 = vld [vmem:[%s4937_s12 + $0x13c] ss:$36 sps:$4 sm:$0xff]  }
  0xe1   : > { %1941 = vmatmul.mubr.bf16.gmra.mrb[28].mxu0 %v4295_v20  ;;  %2070 = vmatmul.mubr.bf16.gmra.mrb[28].mxu1 %v4296_v21  ;;  %v4385_v20 = vld [vmem:[%s4937_s12 + $0x444] ss:$36 sps:$4 sm:$0xff]   ;;  %v4387_v21 = vld [vmem:[%s4937_s12 + $0x20c] ss:$36 sps:$4 sm:$0xff]  }
  0xe2   : > { %1948 = vmatprep.mubr.bf16.mxu0 %v4297_v22  ;;  %2077 = vmatprep.mubr.bf16.mxu1 %v4299_v23  ;;  %v4389_v22 = vld [vmem:[%s4937_s12 + $0x440] ss:$36 sps:$4 sm:$0xff]   ;;  %v4390_v23 = vld [vmem:[%s4937_s12 + $0x208] ss:$36 sps:$4 sm:$0xff]  }
  0xe3   : > { %3914 = vmatpush3.bf16.msra.mxu1 %v4368_v42  ;;  %v4421_v42 = vld [vmem:[%s4937_s12 + $0x370] ss:$36 sps:$4 sm:$0xff]  }
  0xe4   : > { %3915 = vmatprep.subr.bf16.mxu1 %v4382_v47  ;;  %v4429_v47 = vld [vmem:[%s4937_s12 + $0x180] ss:$36 sps:$4 sm:$0xff]  }
  0xe7   : > { %3916 = vmatpush3.bf16.msra.mxu1 %v4383_v48  ;;  %v4430_v48 = vld [vmem:[%s4937_s12 + $0x404] ss:$36 sps:$4 sm:$0xff]  }
  0xe9   : > { %1949 = vmatmul.mubr.bf16.gmra.mrb[32].mxu0 %v4301_v27  ;;  %2078 = vmatmul.mubr.bf16.gmra.mrb[32].mxu1 %v4302_v30  ;;  %v4396_v27 = vld [vmem:[%s4937_s12 + $0x250] ss:$36 sps:$4 sm:$0xff]   ;;  %v4402_v30 = vld [vmem:[%s4937_s12 + $0x298] ss:$36 sps:$4 sm:$0xff]  }
  0xea   : > { %1956 = vmatprep.mubr.bf16.mxu0 %v4307_v31  ;;  %2085 = vmatprep.mubr.bf16.mxu1 %v4309_v32  ;;  %v4403_v31 = vld [vmem:[%s4937_s12 + $0x60] ss:$36 sps:$4 sm:$0xff]  }
  0xeb   : > { %v4404_v32 = vld [vmem:[%s4937_s12 + $0x2e4] ss:$36 sps:$4 sm:$0xff]  }
  0xf1   : > { %1957 = vmatmul.mubr.bf16.gmra.mrb[36].mxu0 %v4311_v34  ;;  %2086 = vmatmul.mubr.bf16.gmra.mrb[36].mxu1 %v4312_v36  ;;  %v4408_v34 = vld [vmem:[%s4937_s12 + $0x2e0] ss:$36 sps:$4 sm:$0xff]   ;;  %v4411_v36 = vld [vmem:[%s4937_s12 + $0x32c] ss:$36 sps:$4 sm:$0xff]  }
  0xf2   : > { %1964 = vmatprep.mubr.bf16.mxu0 %v4315_v37  ;;  %2093 = vmatprep.mubr.bf16.mxu1 %v4317_v38  ;;  %v4413_v37 = vld [vmem:[%s4937_s12 + $0xf4] ss:$36 sps:$4 sm:$0xff]   ;;  %v4415_v38 = vld [vmem:[%s4937_s12 + $0x328] ss:$36 sps:$4 sm:$0xff]  }
  0xf9   : > { %1965 = vmatmul.mubr.bf16.gmra.mrb[40].mxu0 %v4319_v39  ;;  %2094 = vmatmul.mubr.bf16.gmra.mrb[40].mxu1 %v4320_v40  ;;  %v4416_v39 = vld [vmem:[%s4937_s12 + $0xf0] ss:$36 sps:$4 sm:$0xff]  }
  0xfa   : > { %1972 = vmatprep.mubr.bf16.mxu0 %v4323_v43  ;;  %2101 = vmatprep.mubr.bf16.mxu1 %v4325_v44  ;;  %v4417_v40 = vld [vmem:[%s4937_s12 + $0x374] ss:$36 sps:$4 sm:$0xff]   ;;  %v4424_v44 = vld [vmem:[%s4937_s12 + $0x3bc] ss:$36 sps:$4 sm:$0xff]  }
  0xfb   : > { %v4422_v43 = vld [vmem:[%s4937_s12 + $0x138] ss:$36 sps:$4 sm:$0xff]  }
 0x101   : > { %1973 = vmatmul.mubr.bf16.gmra.mrb[44].mxu0 %v4327_v45  ;;  %2102 = vmatmul.mubr.bf16.gmra.mrb[44].mxu1 %v4328_v46  ;;  %v4426_v45 = vld [vmem:[%s4937_s12 + $0x184] ss:$36 sps:$4 sm:$0xff]   ;;  %v4428_v46 = vld [vmem:[%s4937_s12 + $0x3b8] ss:$36 sps:$4 sm:$0xff]  }
 0x102   : > { %2109 = vmatprep.mubr.bf16.mxu1 %v4331_v49  ;;  %2206 = vmatprep.mubr.bf16.mxu0 %v4335_v50  ;;  %v4432_v49 = vld [vmem:[%s4937_s12 + $0x1cc] ss:$36 sps:$4 sm:$0xff]   ;;  %v4434_v50 = vld [vmem:[%s4937_s12 + $0x400] ss:$36 sps:$4 sm:$0xff]  }
 0x109   : > { %2110 = vmatmul.mubr.bf16.gmra.mrb[48].mxu1 %v4336_v52  ;;  %2207 = vmatmul.mubr.bf16.vlgmr.msra.gmra.mrb[48].mxu0 %v4333_v51  ;;  %v4435_v51 = vld [vmem:[%s4937_s12 + $0x1c8] ss:$36 sps:$4 sm:$0xff]  }
 0x10a   : > { %4038 = vmatpush3.bf16.msra.mxu0 %v4339_v29  ;;  %2117 = vmatprep.mubr.bf16.mxu1 %v4340_v53  ;;  %v4400_v29 = vld [vmem:[%s4937_s12 + $0x64] ss:$36 sps:$4 sm:$0xff]   ;;  %v4437_v52 = vld [vmem:[%s4937_s12 + $0x44c] ss:$36 sps:$4 sm:$0xff]   ;;  %v4439_v53 = vld [vmem:[%s4937_s12 + $0x214] ss:$36 sps:$4 sm:$0xff]  }
 0x10b   : > { %2214 = vmatprep.mubr.bf16.mxu0 %v4342_v54  ;;  %4039 = vmatprep.subr.bf16.mxu0 %v4354_v55 }
 0x10e   : > { %4040 = vmatpush3.bf16.msra.mxu0 %v4354_v55 }
 0x10f   : > { %4041 = vmatprep.subr.bf16.mxu0 %v4369_v56 }
 0x111   : > { %2118 = vmatmul.mubr.bf16.gmra.mrb[52].mxu1 %v4344_v57  ;;  %2215 = vmatmul.mubr.bf16.gmra.mrb[52].mxu0 %v4345_v58  ;;  %v4441_v58 = vld [vmem:[%s4937_s12 + $0x448] ss:$36 sps:$4 sm:$0xff]  }
 0x112   : > { %2125 = vmatprep.mubr.bf16.mxu1 %v4346_v59  ;;  %2222 = vmatprep.mubr.bf16.mxu0 %v4348_v60  ;;  %v4442_v59 = vld [vmem:[%s4937_s12 + $0x210] ss:$36 sps:$4 sm:$0xff]  }
 0x113   : > { %4042 = vmatpush3.bf16.msra.mxu0 %v4369_v56 }
 0x114   : > { %4043 = vmatprep.subr.bf16.mxu0 %v4384_v61 }
 0x117   : > { %4044 = vmatpush3.bf16.msra.mxu0 %v4384_v61 }
 0x118   : > { %4045 = vmatprep.subr.bf16.mxu0 %v4397_v62 }
 0x119   : > { %2126 = vmatmul.mubr.bf16.gmra.mrb[56].mxu1 %v4350_v63  ;;  %2223 = vmatmul.mubr.bf16.gmra.mrb[56].mxu0 %v4351_v0  ;;  %v4443_v0 = vld [vmem:[%s4937_s12 + $0x25c] ss:$36 sps:$4 sm:$0xff]  }
 0x11a   : > { %2133 = vmatprep.mubr.bf16.mxu1 %v4355_v1  ;;  %2230 = vmatprep.mubr.bf16.mxu0 %v4357_v2  ;;  %v4445_v1 = vld [vmem:[%s4937_s12 + $0x20] ss:$36 sps:$4 sm:$0xff]  }
 0x11b   : > { %4046 = vmatpush3.bf16.msra.mxu0 %v4397_v62 }
 0x11c   : > { %4047 = vmatprep.subr.bf16.mxu0 %v4410_v3 }
 0x11f   : > { %4048 = vmatpush3.bf16.msra.mxu0 %v4410_v3 }
 0x120   : > { %4049 = vmatprep.subr.bf16.mxu0 %v4423_v6 }
 0x121   : > { %2134 = vmatmul.mubr.bf16.gmra.mrb[60].mxu1 %v4359_v4  ;;  %2231 = vmatmul.mubr.bf16.gmra.mrb[60].mxu0 %v4360_v5 }
 0x122   : > { %2141 = vmatprep.mubr.bf16.mxu1 %v4361_v7  ;;  %2238 = vmatprep.mubr.bf16.mxu0 %v4363_v8 }
 0x123   : > { %4050 = vmatpush3.bf16.msra.mxu0 %v4423_v6 }
 0x124   : > { %4051 = vmatprep.subr.bf16.mxu0 %v4436_v9 }
 0x127   : > { %4052 = vmatpush3.bf16.msra.mxu0 %v4436_v9 }
 0x129   : > { %2142 = vmatmul.mubr.bf16.gmra.mrb[64].mxu1 %v4365_v10  ;;  %2239 = vmatmul.mubr.bf16.gmra.mrb[64].mxu0 %v4366_v11  ;;  %v4446_v10 = vld [vmem:[%s4937_s12 + $0x258] ss:$36 sps:$4 sm:$0xff]   ;;  %v4447_v11 = vld [vmem:[%s4937_s12 + $0x68] ss:$36 sps:$4 sm:$0xff]  }
 0x12a   : > { %2149 = vmatprep.mubr.bf16.mxu1 %v4370_v12  ;;  %2246 = vmatprep.mubr.bf16.mxu0 %v4372_v13 }
 0x131   : > { %2150 = vmatmul.mubr.bf16.gmra.mrb[68].mxu1 %v4374_v14  ;;  %2247 = vmatmul.mubr.bf16.gmra.mrb[68].mxu0 %v4375_v15 }
 0x132   : > { %2157 = vmatprep.mubr.bf16.mxu1 %v4376_v16  ;;  %2254 = vmatprep.mubr.bf16.mxu0 %v4378_v17  ;;  %v4448_v16 = vld [vmem:[%s4937_s12 + $0x2a4] ss:$36 sps:$4 sm:$0xff]   ;;  %v4450_v17 = vld [vmem:[%s4937_s12 + $0xb0] ss:$36 sps:$4 sm:$0xff]  }
 0x139   : > { %2158 = vmatmul.mubr.bf16.gmra.mrb[72].mxu1 %v4380_v18  ;;  %2255 = vmatmul.mubr.bf16.gmra.mrb[72].mxu0 %v4381_v19 }
 0x13a   : > { %2165 = vmatprep.mubr.bf16.mxu1 %v4385_v20  ;;  %2262 = vmatprep.mubr.bf16.mxu0 %v4387_v21 }
 0x141   : > { %2166 = vmatmul.mubr.bf16.gmra.mrb[76].mxu1 %v4389_v22  ;;  %2263 = vmatmul.mubr.bf16.gmra.mrb[76].mxu0 %v4390_v23 }
 0x142   : > { %2270 = vmatprep.mubr.bf16.mxu0 %v4391_v24  ;;  %2367 = vmatprep.mubr.bf16.mxu1 %v4395_v25 }
 0x149   : > { %2271 = vmatmul.mubr.bf16.gmra.mrb[80].mxu0 %v4396_v27  ;;  %2368 = vmatmul.mubr.bf16.vlgmr.msra.gmra.mrb[80].mxu1 %v4393_v26  ;;  %v4451_v26 = vld [vmem:[%s4937_s12 + $0x2a0] ss:$36 sps:$4 sm:$0xff]   ;;  %v4452_v27 = vld [vmem:[%s4937_s12 + $0xf8] ss:$36 sps:$4 sm:$0xff]  }
 0x14a   : > { %2278 = vmatprep.mubr.bf16.mxu0 %v4398_v28  ;;  %2375 = vmatprep.mubr.bf16.mxu1 %v4400_v29 }
 0x151   : > { %2279 = vmatmul.mubr.bf16.gmra.mrb[84].mxu0 %v4402_v30  ;;  %2376 = vmatmul.mubr.bf16.gmra.mrb[84].mxu1 %v4403_v31 }
 0x152   : > { %2286 = vmatprep.mubr.bf16.mxu0 %v4404_v32  ;;  %2383 = vmatprep.mubr.bf16.mxu1 %v4406_v33  ;;  %v4453_v32 = vld [vmem:[%s4937_s12 + $0x2ec] ss:$36 sps:$4 sm:$0xff]   ;;  %v4455_v33 = vld [vmem:[%s4937_s12 + $0x140] ss:$36 sps:$4 sm:$0xff]  }
 0x159   : > { %2287 = vmatmul.mubr.bf16.gmra.mrb[88].mxu0 %v4408_v34  ;;  %2384 = vmatmul.mubr.bf16.gmra.mrb[88].mxu1 %v4409_v35 }
 0x15a   : > { %2294 = vmatprep.mubr.bf16.mxu0 %v4411_v36  ;;  %2391 = vmatprep.mubr.bf16.mxu1 %v4413_v37 }
 0x161   : > { %2295 = vmatmul.mubr.bf16.gmra.mrb[92].mxu0 %v4415_v38  ;;  %2392 = vmatmul.mubr.bf16.gmra.mrb[92].mxu1 %v4416_v39 }
 0x162   : > { %2302 = vmatprep.mubr.bf16.mxu0 %v4417_v40  ;;  %2399 = vmatprep.mubr.bf16.mxu1 %v4419_v41 }
 0x169   : > { %2303 = vmatmul.mubr.bf16.gmra.mrb[96].mxu0 %v4421_v42  ;;  %2400 = vmatmul.mubr.bf16.gmra.mrb[96].mxu1 %v4422_v43  ;;  %v4456_v42 = vld [vmem:[%s4937_s12 + $0x2e8] ss:$36 sps:$4 sm:$0xff]  }
 0x16a   : > { %2310 = vmatprep.mubr.bf16.mxu0 %v4424_v44  ;;  %2407 = vmatprep.mubr.bf16.mxu1 %v4426_v45  ;;  %v4457_v43 = vld [vmem:[%s4937_s12 + $0x188] ss:$36 sps:$4 sm:$0xff]  }
 0x171   : > { %2311 = vmatmul.mubr.bf16.gmra.mrb[100].mxu0 %v4428_v46  ;;  %2408 = vmatmul.mubr.bf16.gmra.mrb[100].mxu1 %v4429_v47 }
 0x172   : > { %2318 = vmatprep.mubr.bf16.mxu0 %v4430_v48  ;;  %2415 = vmatprep.mubr.bf16.mxu1 %v4432_v49  ;;  %v4458_v48 = vld [vmem:[%s4937_s12 + $0x334] ss:$36 sps:$4 sm:$0xff]  }
 0x173   : > { %v4460_v49 = vld [vmem:[%s4937_s12 + $0x1d0] ss:$36 sps:$4 sm:$0xff]  }
 0x179   : > { %2319 = vmatmul.mubr.bf16.gmra.mrb[104].mxu0 %v4434_v50  ;;  %2416 = vmatmul.mubr.bf16.gmra.mrb[104].mxu1 %v4435_v51 }
 0x17a   : > { %2326 = vmatprep.mubr.bf16.mxu0 %v4437_v52  ;;  %2423 = vmatprep.mubr.bf16.mxu1 %v4439_v53 }
 0x17c   : > { %v3653_v54 = vpop.f32.mrb[0].mxu1  ;;  %v3581_v55 = vpop.f32.mrb[0].mxu0 }
 0x17d   : > { %v3654_v56 = vpop.f32.mrb[1].mxu1  ;;  %v3582_v57 = vpop.f32.mrb[1].mxu0 }
 0x17e   : > { %v5063_v60 = vadd.f32 %v3654_v56, %v3653_v54  ;;  %v3656_v61 = vpop.f32.mrb[2].mxu1  ;;  %v5065_v62 = vadd.f32 %v3582_v57, %v3581_v55  ;;  %v3584_v63 = vpop.f32.mrb[2].mxu0 }
 0x17f   : > { %v3657_v2 = vpop.f32.mrb[3].mxu1  ;;  %v3585_v3 = vpop.f32.mrb[3].mxu0 }
 0x180   : > { %v5069_v4 = vadd.f32 %v3657_v2, %v3656_v61  ;;  %v5071_v5 = vadd.f32 %v3585_v3, %v3584_v63  ;;  %v4463_v2 = vld [vmem:[%s4937_s12 + $0x37c] ss:$36 sps:$4 sm:$0xff]  }
 0x181   : > { %2327 = vmatmul.mubr.bf16.gmra.mrb[108].mxu0 %v4441_v58  ;;  %2424 = vmatmul.mubr.bf16.gmra.mrb[108].mxu1 %v4442_v59  ;;  %v4461_v58 = vld [vmem:[%s4937_s12 + $0x330] ss:$36 sps:$4 sm:$0xff]   ;;  %v4462_v59 = vld [vmem:[%s4937_s12 + $0x218] ss:$36 sps:$4 sm:$0xff]   ;;  %v4465_v3 = vld [vmem:[%s4937_s12 + $0x260] ss:$36 sps:$4 sm:$0xff]  }
 0x182   : > { %2431 = vmatprep.mubr.bf16.mxu1 %v4443_v0  ;;  %4053 = vmatprep.mubr.bf16.mxu0 %v4445_v1 }
 0x184   : > { %v3659_v6 = vpop.f32.mrb[4].mxu1  ;;  %v3587_v7 = vpop.f32.mrb[4].mxu0 }
 0x185   : > { %v3660_v8 = vpop.f32.mrb[5].mxu1  ;;  %v3588_v9 = vpop.f32.mrb[5].mxu0 }
 0x186   : > { %v5075_v12 = vadd.f32 %v3660_v8, %v3659_v6  ;;  %v3662_v13 = vpop.f32.mrb[6].mxu1  ;;  %v5077_v14 = vadd.f32 %v3588_v9, %v3587_v7  ;;  %v3590_v15 = vpop.f32.mrb[6].mxu0 }
 0x187   : > { %v3663_v18 = vpop.f32.mrb[7].mxu1  ;;  %v3591_v19 = vpop.f32.mrb[7].mxu0 }
 0x188   : > { %v5081_v20 = vadd.f32 %v3663_v18, %v3662_v13  ;;  %v5083_v21 = vadd.f32 %v3591_v19, %v3590_v15  ;;  %v4466_v18 = vld [vmem:[%s4937_s12 + $0x378] ss:$36 sps:$4 sm:$0xff]   ;;  %v4467_v19 = vld [vmem:[%s4937_s12 + $0x2a8] ss:$36 sps:$4 sm:$0xff]  }
 0x189   : > { %2432 = vmatmul.mubr.bf16.gmra.mrb[112].mxu1 %v4446_v10  ;;  %4054 = vmatmul.mubr.bf16.vlgmr.msra.gmra.mrb[112].mxu0 %v4447_v11 }
 0x18a   : > { %2439 = vmatprep.mubr.bf16.mxu1 %v4448_v16  ;;  %4057 = vmatprep.mubr.bf16.mxu0 %v4450_v17 }
 0x18c   : > { %v3665_v22 = vpop.f32.mrb[8].mxu1  ;;  %v3593_v23 = vpop.f32.mrb[8].mxu0 }
 0x18d   : > { %v3666_v24 = vpop.f32.mrb[9].mxu1  ;;  %v3594_v25 = vpop.f32.mrb[9].mxu0 }
 0x18e   : > { %v5087_v28 = vadd.f32 %v3666_v24, %v3665_v22  ;;  %v3668_v29 = vpop.f32.mrb[10].mxu1  ;;  %v5089_v30 = vadd.f32 %v3594_v25, %v3593_v23  ;;  %v3596_v31 = vpop.f32.mrb[10].mxu0  ;;  %v4468_v25 = vld [vmem:[%s4937_s12 + $0x3c4] ss:$36 sps:$4 sm:$0xff]  }
 0x18f   : > { %v3669_v34 = vpop.f32.mrb[11].mxu1  ;;  %v3597_v35 = vpop.f32.mrb[11].mxu0 }
 0x190   : > { %v5093_v36 = vadd.f32 %v3669_v34, %v3668_v29  ;;  %v5095_v37 = vadd.f32 %v3597_v35, %v3596_v31 }
 0x191   : > { %2440 = vmatmul.mubr.bf16.gmra.mrb[116].mxu1 %v4451_v26  ;;  %4058 = vmatmul.mubr.bf16.gmra.mrb[116].mxu0 %v4452_v27  ;;  %v4470_v26 = vld [vmem:[%s4937_s12 + $0x2f0] ss:$36 sps:$4 sm:$0xff]  }
 0x192   : > { %2447 = vmatprep.mubr.bf16.mxu1 %v4453_v32  ;;  %4061 = vmatprep.mubr.bf16.mxu0 %v4455_v33 }
 0x194   : > { %v3671_v38 = vpop.f32.mrb[12].mxu1  ;;  %v3599_v39 = vpop.f32.mrb[12].mxu0 }
 0x195   : > { %v3672_v40 = vpop.f32.mrb[13].mxu1  ;;  %v3600_v41 = vpop.f32.mrb[13].mxu0 }
 0x196   : > { %v5099_v44 = vadd.f32 %v3672_v40, %v3671_v38  ;;  %v3674_v45 = vpop.f32.mrb[14].mxu1  ;;  %v5101_v46 = vadd.f32 %v3600_v41, %v3599_v39  ;;  %v3602_v47 = vpop.f32.mrb[14].mxu0  ;;  %v4471_v40 = vld [vmem:[%s4937_s12 + $0x3c0] ss:$36 sps:$4 sm:$0xff]   ;;  %v4472_v41 = vld [vmem:[%s4937_s12 + $0x338] ss:$36 sps:$4 sm:$0xff]  }
 0x197   : > { %v3675_v50 = vpop.f32.mrb[15].mxu1  ;;  %v3603_v51 = vpop.f32.mrb[15].mxu0 }
 0x198   : > { %v5105_v52 = vadd.f32 %v3675_v50, %v3674_v45  ;;  %v5107_v53 = vadd.f32 %v3603_v51, %v3602_v47  ;;  %v4473_v47 = vld [vmem:[%s4937_s12 + $0x40c] ss:$36 sps:$4 sm:$0xff]  }
 0x199   : > { %2448 = vmatmul.mubr.bf16.gmra.mrb[120].mxu1 %v4456_v42  ;;  %4062 = vmatmul.mubr.bf16.gmra.mrb[120].mxu0 %v4457_v43 }
 0x19a   : > { %2455 = vmatprep.mubr.bf16.mxu1 %v4458_v48  ;;  %4065 = vmatprep.mubr.bf16.mxu0 %v4460_v49  ;;  %v4475_v48 = vld [vmem:[%s4937_s12 + $0x380] ss:$36 sps:$4 sm:$0xff]  }
 0x19c   : > { %v3693_v54 = vpop.f32.mrb[16].mxu1  ;;  %v3605_v55 = vpop.f32.mrb[16].mxu0 }
 0x19d   : > { %v3694_v56 = vpop.f32.mrb[17].mxu1  ;;  %v3606_v57 = vpop.f32.mrb[17].mxu0 }
 0x19e   : > { %v3695_v61 = vadd.f32 %v3694_v56, %v3693_v54  ;;  %v3696_v63 = vpop.f32.mrb[18].mxu1  ;;  %v5111_v0 = vadd.f32 %v3606_v57, %v3605_v55  ;;  %v3608_v1 = vpop.f32.mrb[18].mxu0 }
 0x19f   : > { %v3697_v6 = vpop.f32.mrb[19].mxu1  ;;  %v3609_v7 = vpop.f32.mrb[19].mxu0 }
 0x1a0   : > { %v5116_v8 = vadd.f32 %v3695_v61, %v5065_v62  ;;  %v3698_v9 = vadd.f32 %v3697_v6, %v3696_v63  ;;  %v5118_v10 = vadd.f32 %v3609_v7, %v3608_v1  ;;  %v4476_v61 = vld [vmem:[%s4937_s12 + $0x408] ss:$36 sps:$4 sm:$0xff]   ;;  %v4478_v6 = vld [vmem:[%s4937_s12 + $0x454] ss:$36 sps:$4 sm:$0xff]  }
 0x1a1   : > { %2456 = vmatmul.mubr.bf16.gmra.mrb[124].mxu1 %v4461_v58  ;;  %4066 = vmatmul.mubr.bf16.gmra.mrb[124].mxu0 %v4462_v59  ;;  %v4477_v63 = vld [vmem:[%s4937_s12 + $0x3c8] ss:$36 sps:$4 sm:$0xff]   ;;  %v4480_v7 = vld [vmem:[%s4937_s12 + $0x410] ss:$36 sps:$4 sm:$0xff]  }
 0x1a2   : > { %v5121_v11 = vadd.f32 %v3698_v9, %v5071_v5  ;;  %2463 = vmatprep.mubr.bf16.mxu1 %v4463_v2  ;;  %4069 = vmatprep.mubr.bf16.mxu0 %v4465_v3 }
 0x1a4   : > { %v3699_v13 = vpop.f32.mrb[20].mxu1  ;;  %v3611_v15 = vpop.f32.mrb[20].mxu0 }
 0x1a5   : > { %v3700_v16 = vpop.f32.mrb[21].mxu1  ;;  %v3612_v17 = vpop.f32.mrb[21].mxu0 }
 0x1a6   : > { %v3701_v62 = vadd.f32 %v3700_v16, %v3699_v13  ;;  %v3702_v22 = vpop.f32.mrb[22].mxu1  ;;  %v5125_v23 = vadd.f32 %v3612_v17, %v3611_v15  ;;  %v3614_v24 = vpop.f32.mrb[22].mxu0 }
 0x1a7   : > { %v3703_v27 = vpop.f32.mrb[23].mxu1  ;;  %v3615_v5 = vpop.f32.mrb[23].mxu0 }
 0x1a8   : > { %v5130_v29 = vadd.f32 %v3701_v62, %v5077_v14  ;;  %v3704_v31 = vadd.f32 %v3703_v27, %v3702_v22  ;;  %v5132_v32 = vadd.f32 %v3615_v5, %v3614_v24  ;;  %v4481_v24 = vld [vmem:[%s4937_s12 + $0x450] ss:$36 sps:$4 sm:$0xff]  }
 0x1a9   : > { %2464 = vmatmul.mubr.bf16.gmra.mrb[128].mxu1 %v4466_v18  ;;  %4070 = vmatmul.mubr.bf16.gmra.mrb[128].mxu0 %v4467_v19 }
 0x1aa   : > { %v5135_v33 = vadd.f32 %v3704_v31, %v5083_v21  ;;  %2471 = vmatprep.mubr.bf16.mxu1 %v4468_v25  ;;  %4073 = vmatprep.mubr.bf16.mxu0 %v4470_v26  ;;  %v4482_v25 = vld [vmem:[%s4937_s12 + $0x458] ss:$36 sps:$4 sm:$0xff]  }
 0x1ac   : > { %v3705_v34 = vpop.f32.mrb[24].mxu1  ;;  %v3617_v35 = vpop.f32.mrb[24].mxu0 }
 0x1ad   : > { %v3706_v38 = vpop.f32.mrb[25].mxu1  ;;  %v3618_v39 = vpop.f32.mrb[25].mxu0 }
 0x1ae   : > { %v3707_v14 = vadd.f32 %v3706_v38, %v3705_v34  ;;  %v3708_v42 = vpop.f32.mrb[26].mxu1  ;;  %v5139_v43 = vadd.f32 %v3618_v39, %v3617_v35  ;;  %v3620_v45 = vpop.f32.mrb[26].mxu0 }
 0x1af   : > { %v3709_v49 = vpop.f32.mrb[27].mxu1  ;;  %v3621_v21 = vpop.f32.mrb[27].mxu0 }
 0x1b0   : > { %v5144_v50 = vadd.f32 %v3707_v14, %v5089_v30  ;;  %v3710_v51 = vadd.f32 %v3709_v49, %v3708_v42  ;;  %v5146_v54 = vadd.f32 %v3621_v21, %v3620_v45 }
 0x1b1   : > { %2472 = vmatmul.mubr.bf16.gmra.mrb[132].mxu1 %v4471_v40  ;;  %4074 = vmatmul.mubr.bf16.gmra.mrb[132].mxu0 %v4472_v41 }
 0x1b2   : > { %v5149_v55 = vadd.f32 %v3710_v51, %v5095_v37  ;;  %2479 = vmatprep.mubr.bf16.mxu1 %v4473_v47  ;;  %4077 = vmatprep.mubr.bf16.mxu0 %v4475_v48 }
 0x1b4   : > { %v3711_v56 = vpop.f32.mrb[28].mxu1  ;;  %v3623_v57 = vpop.f32.mrb[28].mxu0 }
 0x1b5   : > { %v3712_v58 = vpop.f32.mrb[29].mxu1  ;;  %v3624_v59 = vpop.f32.mrb[29].mxu0 }
 0x1b6   : > { %v3713_v30 = vadd.f32 %v3712_v58, %v3711_v56  ;;  %v3714_v1 = vpop.f32.mrb[30].mxu1  ;;  %v5153_v2 = vadd.f32 %v3624_v59, %v3623_v57  ;;  %v3626_v3 = vpop.f32.mrb[30].mxu0 }
 0x1b7   : > { %v3715_v9 = vpop.f32.mrb[31].mxu1  ;;  %v3627_v37 = vpop.f32.mrb[31].mxu0 }
 0x1b8   : > { %v5158_v13 = vadd.f32 %v3713_v30, %v5101_v46  ;;  %v3716_v15 = vadd.f32 %v3715_v9, %v3714_v1  ;;  %v5160_v16 = vadd.f32 %v3627_v37, %v3626_v3 }
 0x1b9   : > { %2480 = vmatmul.mubr.bf16.gmra.mrb[136].mxu1 %v4476_v61  ;;  %4078 = vmatmul.mubr.bf16.gmra.mrb[136].mxu0 %v4477_v63 }
 0x1ba   : > { %v5163_v17 = vadd.f32 %v3716_v15, %v5107_v53  ;;  %2487 = vmatprep.mubr.bf16.mxu1 %v4478_v6  ;;  %4081 = vmatprep.mubr.bf16.mxu0 %v4480_v7 }
 0x1bc   : > { %v3717_v18 = vpop.f32.mrb[32].mxu1  ;;  %v3629_v19 = vpop.f32.mrb[32].mxu0 }
 0x1bd   : > { %v3718_v62 = vpop.f32.mrb[33].mxu1  ;;  %v3630_v22 = vpop.f32.mrb[33].mxu0 }
 0x1be   : > { %v3719_v26 = vadd.f32 %v3718_v62, %v3717_v18  ;;  %v3720_v27 = vpop.f32.mrb[34].mxu1  ;;  %v3631_v46 = vadd.f32 %v3630_v22, %v3629_v19  ;;  %v3632_v5 = vpop.f32.mrb[34].mxu0 }
 0x1bf   : > { %v3721_v31 = vpop.f32.mrb[35].mxu1  ;;  %v3633_v34 = vpop.f32.mrb[35].mxu0 }
 0x1c0   : > { %v5168_v35 = vadd.f32 %v3719_v26, %v5111_v0  ;;  %v3722_v38 = vadd.f32 %v3721_v31, %v3720_v27  ;;  %v3634_v53 = vadd.f32 %v3633_v34, %v3632_v5 }
 0x1c1   : > { %2488 = vmatmul.mubr.bf16.gmra.mrb[140].mxu1 %v4481_v24  ;;  %4082 = vmatmul.mubr.bf16.gmra.mrb[140].mxu0 %v4482_v25 }
 0x1c2   : > { %v5171_v39 = vadd.f32 %v3722_v38, %v5118_v10 }
 0x1c4   : > { %v3723_v40 = vpop.f32.mrb[36].mxu1  ;;  %v3635_v41 = vpop.f32.mrb[36].mxu0 }
 0x1c5   : > { %v3724_v14 = vpop.f32.mrb[37].mxu1  ;;  %v3636_v42 = vpop.f32.mrb[37].mxu0 }
 0x1c6   : > { %v3725_v45 = vadd.f32 %v3724_v14, %v3723_v40  ;;  %v3726_v47 = vpop.f32.mrb[38].mxu1  ;;  %v3637_v48 = vadd.f32 %v3636_v42, %v3635_v41  ;;  %v3638_v49 = vpop.f32.mrb[38].mxu0 }
 0x1c7   : > { %v3727_v21 = vpop.f32.mrb[39].mxu1  ;;  %v3639_v51 = vpop.f32.mrb[39].mxu0 }
 0x1c8   : > { %v5174_v0 = vadd.f32 %v3725_v45, %v5125_v23  ;;  %v3728_v56 = vadd.f32 %v3727_v21, %v3726_v47  ;;  %v3640_v57 = vadd.f32 %v3639_v51, %v3638_v49 }
 0x1ca   : > { %v5177_v58 = vadd.f32 %v3728_v56, %v5132_v32 }
 0x1cc   : > { %v3729_v10 = vpop.f32.mrb[40].mxu1  ;;  %v3641_v59 = vpop.f32.mrb[40].mxu0 }
 0x1cd   : > { %v3730_v61 = vpop.f32.mrb[41].mxu1  ;;  %v3642_v63 = vpop.f32.mrb[41].mxu0 }
 0x1ce   : > { %v3731_v30 = vadd.f32 %v3730_v61, %v3729_v10  ;;  %v3732_v1 = vpop.f32.mrb[42].mxu1  ;;  %v5179_v3 = vadd.f32 %v3642_v63, %v3641_v59  ;;  %v3644_v6 = vpop.f32.mrb[42].mxu0 }
 0x1cf   : > { %v3733_v7 = vpop.f32.mrb[43].mxu1  ;;  %v3645_v9 = vpop.f32.mrb[43].mxu0 }
 0x1d0   : > { %v5182_v37 = vadd.f32 %v3731_v30, %v5139_v43  ;;  %v3734_v23 = vadd.f32 %v3733_v7, %v3732_v1  ;;  %v3646_v15 = vadd.f32 %v3645_v9, %v3644_v6 }
 0x1d2   : > { %v5185_v18 = vadd.f32 %v3734_v23, %v5146_v54 }
 0x1d4   : > { %v3735_v32 = vpop.f32.mrb[44].mxu1  ;;  %v3647_v19 = vpop.f32.mrb[44].mxu0 }
 0x1d5   : > { %v3736_v62 = vpop.f32.mrb[45].mxu1  ;;  %v3648_v22 = vpop.f32.mrb[45].mxu0 }
 0x1d6   : > { %v3737_v24 = vadd.f32 %v3736_v62, %v3735_v32  ;;  %v3738_v25 = vpop.f32.mrb[46].mxu1  ;;  %v5187_v26 = vadd.f32 %v3648_v22, %v3647_v19  ;;  %v3650_v27 = vpop.f32.mrb[46].mxu0 }
 0x1d7   : > { %v3739_v5 = vpop.f32.mrb[47].mxu1  ;;  %v3651_v31 = vpop.f32.mrb[47].mxu0 }
 0x1d8   : > { %v5190_v34 = vadd.f32 %v3737_v24, %v5153_v2  ;;  %v3740_v43 = vadd.f32 %v3739_v5, %v3738_v25  ;;  %v5192_v38 = vadd.f32 %v3651_v31, %v3650_v27 }
 0x1da   : > { %v5195_v54 = vadd.f32 %v3740_v43, %v5160_v16 }
 0x1dc   : > { %v3741_v40 = vpop.f32.mrb[48].mxu1  ;;  %v3805_v41 = vpop.f32.mrb[48].mxu0 }
 0x1dd   : > { %v3742_v14 = vpop.f32.mrb[49].mxu1  ;;  %v3806_v42 = vpop.f32.mrb[49].mxu0 }
 0x1de   : > { %v3743_v45 = vadd.f32 %v3742_v14, %v3741_v40  ;;  %v3807_v47 = vadd.f32 %v3806_v42, %v3805_v41  ;;  %v3744_v49 = vpop.f32.mrb[50].mxu1  ;;  %v3808_v21 = vpop.f32.mrb[50].mxu0 }
 0x1df   : > { %v3745_v51 = vpop.f32.mrb[51].mxu1  ;;  %v3809_v56 = vpop.f32.mrb[51].mxu0 }
 0x1e0   : > { %v5197_v10 = vadd.f32 %v3743_v45, %v3631_v46  ;;  %v5200_v2 = vadd.f32 %v3807_v47, %v5116_v8  ;;  %v3746_v59 = vadd.f32 %v3745_v51, %v3744_v49  ;;  %v3810_v61 = vadd.f32 %v3809_v56, %v3808_v21 }
 0x1e2   : > { %v5202_v63 = vadd.f32 %v3746_v59, %v3634_v53  ;;  %v5205_v16 = vadd.f32 %v3810_v61, %v5121_v11 }
 0x1e4   : > { %v3747_v30 = vpop.f32.mrb[52].mxu1  ;;  %v3811_v1 = vpop.f32.mrb[52].mxu0 }
 0x1e5   : > { %v3748_v6 = vpop.f32.mrb[53].mxu1  ;;  %v3812_v7 = vpop.f32.mrb[53].mxu0 }
 0x1e6   : > { %v3749_v9 = vadd.f32 %v3748_v6, %v3747_v30  ;;  %v3813_v23 = vadd.f32 %v3812_v7, %v3811_v1  ;;  %v3750_v32 = vpop.f32.mrb[54].mxu1  ;;  %v3814_v19 = vpop.f32.mrb[54].mxu0 }
 0x1e7   : > { %v3751_v46 = vpop.f32.mrb[55].mxu1  ;;  %v3815_v62 = vpop.f32.mrb[55].mxu0 }
 0x1e8   : > { %v5207_v22 = vadd.f32 %v3749_v9, %v3637_v48  ;;  %v5210_v8 = vadd.f32 %v3813_v23, %v5130_v29  ;;  %v3752_v53 = vadd.f32 %v3751_v46, %v3750_v32  ;;  %v3816_v24 = vadd.f32 %v3815_v62, %v3814_v19 }
 0x1ea   : > { %v5212_v25 = vadd.f32 %v3752_v53, %v3640_v57  ;;  %v5215_v11 = vadd.f32 %v3816_v24, %v5135_v33 }
 0x1ec   : > { %v3753_v27 = vpop.f32.mrb[56].mxu1  ;;  %v3817_v5 = vpop.f32.mrb[56].mxu0 }
 0x1ed   : > { %v3754_v31 = vpop.f32.mrb[57].mxu1  ;;  %v3818_v43 = vpop.f32.mrb[57].mxu0 }
 0x1ee   : > { %v3755_v40 = vadd.f32 %v3754_v31, %v3753_v27  ;;  %v3819_v41 = vadd.f32 %v3818_v43, %v3817_v5  ;;  %v3756_v14 = vpop.f32.mrb[58].mxu1  ;;  %v3820_v42 = vpop.f32.mrb[58].mxu0 }
 0x1ef   : > { %v3757_v48 = vpop.f32.mrb[59].mxu1  ;;  %v3821_v45 = vpop.f32.mrb[59].mxu0 }
 0x1f0   : > { %v5218_v29 = vadd.f32 %v3755_v40, %v5179_v3  ;;  %v5221_v47 = vadd.f32 %v3819_v41, %v5144_v50  ;;  %v3758_v57 = vadd.f32 %v3757_v48, %v3756_v14  ;;  %v3822_v49 = vadd.f32 %v3821_v45, %v3820_v42 }
 0x1f2   : > { %v5223_v33 = vadd.f32 %v3758_v57, %v3646_v15  ;;  %v5226_v21 = vadd.f32 %v3822_v49, %v5149_v55 }
 0x1f4   : > { %v3759_v51 = vpop.f32.mrb[60].mxu1  ;;  %v3823_v56 = vpop.f32.mrb[60].mxu0 }
 0x1f5   : > { %v3760_v59 = vpop.f32.mrb[61].mxu1  ;;  %v3824_v61 = vpop.f32.mrb[61].mxu0 }
 0x1f6   : > { %v3761_v30 = vadd.f32 %v3760_v59, %v3759_v51  ;;  %v3825_v1 = vadd.f32 %v3824_v61, %v3823_v56  ;;  %v3762_v6 = vpop.f32.mrb[62].mxu1  ;;  %v3826_v7 = vpop.f32.mrb[62].mxu0 }
 0x1f7   : > { %v3763_v3 = vpop.f32.mrb[63].mxu1  ;;  %v3827_v9 = vpop.f32.mrb[63].mxu0 }
 0x1f8   : > { %v5229_v50 = vadd.f32 %v3761_v30, %v5187_v26  ;;  %v5232_v23 = vadd.f32 %v3825_v1, %v5158_v13  ;;  %v3764_v15 = vadd.f32 %v3763_v3, %v3762_v6  ;;  %v3828_v32 = vadd.f32 %v3827_v9, %v3826_v7 }
 0x1fa   : > { %v5235_v55 = vadd.f32 %v3764_v15, %v5192_v38  ;;  %v5238_v19 = vadd.f32 %v3828_v32, %v5163_v17 }
 0x1fc   : > { %v3765_v46 = vpop.f32.mrb[64].mxu1  ;;  %v3829_v62 = vpop.f32.mrb[64].mxu0 }
 0x1fd   : > { %v3766_v53 = vpop.f32.mrb[65].mxu1  ;;  %v3830_v24 = vpop.f32.mrb[65].mxu0 }
 0x1fe   : > { %v3767_v27 = vadd.f32 %v3766_v53, %v3765_v46  ;;  %v3831_v5 = vadd.f32 %v3830_v24, %v3829_v62  ;;  %v3768_v31 = vpop.f32.mrb[66].mxu1  ;;  %v3832_v26 = vpop.f32.mrb[66].mxu0 }
 0x1ff   : > { %v3769_v43 = vpop.f32.mrb[67].mxu1  ;;  %v3833_v40 = vpop.f32.mrb[67].mxu0 }
 0x200   : > { %v5241_v13 = vadd.f32 %v3767_v27, %v5063_v60  ;;  %v5244_v41 = vadd.f32 %v3831_v5, %v5168_v35  ;;  %v3770_v38 = vadd.f32 %v3769_v43, %v3768_v31  ;;  %v3834_v14 = vadd.f32 %v3833_v40, %v3832_v26 }
 0x202   : > { %v5247_v17 = vadd.f32 %v3770_v38, %v5069_v4  ;;  %v5250_v42 = vadd.f32 %v3834_v14, %v5171_v39 }
 0x204   : > { %v3771_v48 = vpop.f32.mrb[68].mxu1  ;;  %v3835_v45 = vpop.f32.mrb[68].mxu0 }
 0x205   : > { %v3772_v57 = vpop.f32.mrb[69].mxu1  ;;  %v3836_v49 = vpop.f32.mrb[69].mxu0 }
 0x206   : > { %v3773_v51 = vadd.f32 %v3772_v57, %v3771_v48  ;;  %v3837_v56 = vadd.f32 %v3836_v49, %v3835_v45  ;;  %v3774_v59 = vpop.f32.mrb[70].mxu1  ;;  %v3838_v60 = vpop.f32.mrb[70].mxu0 }
 0x207   : > { %v3775_v61 = vpop.f32.mrb[71].mxu1  ;;  %v3839_v30 = vpop.f32.mrb[71].mxu0 }
 0x208   : > { %v5253_v35 = vadd.f32 %v3773_v51, %v5075_v12  ;;  %v5256_v1 = vadd.f32 %v3837_v56, %v5174_v0  ;;  %v3776_v4 = vadd.f32 %v3775_v61, %v3774_v59  ;;  %v3840_v6 = vadd.f32 %v3839_v30, %v3838_v60 }
 0x20a   : > { %v5259_v39 = vadd.f32 %v3776_v4, %v5081_v20  ;;  %v5262_v7 = vadd.f32 %v3840_v6, %v5177_v58 }
 0x20c   : > { %v3777_v3 = vpop.f32.mrb[72].mxu1  ;;  %v3841_v9 = vpop.f32.mrb[72].mxu0 }
 0x20d   : > { %v3778_v15 = vpop.f32.mrb[73].mxu1  ;;  %v3842_v32 = vpop.f32.mrb[73].mxu0 }
 0x20e   : > { %v3779_v46 = vadd.f32 %v3778_v15, %v3777_v3  ;;  %v3843_v62 = vadd.f32 %v3842_v32, %v3841_v9  ;;  %v3780_v53 = vpop.f32.mrb[74].mxu1  ;;  %v3844_v12 = vpop.f32.mrb[74].mxu0 }
 0x20f   : > { %v3781_v24 = vpop.f32.mrb[75].mxu1  ;;  %v3845_v27 = vpop.f32.mrb[75].mxu0 }
 0x210   : > { %v5265_v0 = vadd.f32 %v3779_v46, %v5087_v28  ;;  %v5268_v5 = vadd.f32 %v3843_v62, %v5182_v37  ;;  %v3782_v20 = vadd.f32 %v3781_v24, %v3780_v53  ;;  %v3846_v31 = vadd.f32 %v3845_v27, %v3844_v12 }
 0x212   : > { %v5271_v58 = vadd.f32 %v3782_v20, %v5093_v36  ;;  %v5274_v26 = vadd.f32 %v3846_v31, %v5185_v18 }
 0x214   : > { %v3783_v43 = vpop.f32.mrb[76].mxu1  ;;  %v3847_v40 = vpop.f32.mrb[76].mxu0 }
 0x215   : > { %v3784_v38 = vpop.f32.mrb[77].mxu1  ;;  %v3848_v14 = vpop.f32.mrb[77].mxu0 }
 0x216   : > { %v3785_v48 = vadd.f32 %v3784_v38, %v3783_v43  ;;  %v3849_v45 = vadd.f32 %v3848_v14, %v3847_v40  ;;  %v3786_v57 = vpop.f32.mrb[78].mxu1  ;;  %v3850_v28 = vpop.f32.mrb[78].mxu0 }
 0x217   : > { %v3787_v49 = vpop.f32.mrb[79].mxu1  ;;  %v3851_v51 = vpop.f32.mrb[79].mxu0 }
 0x218   : > { %v5277_v37 = vadd.f32 %v3785_v48, %v5099_v44  ;;  %v5280_v56 = vadd.f32 %v3849_v45, %v5190_v34  ;;  %v3788_v36 = vadd.f32 %v3787_v49, %v3786_v57  ;;  %v3852_v59 = vadd.f32 %v3851_v51, %v3850_v28 }
 0x21a   : > { %v5283_v18 = vadd.f32 %v3788_v36, %v5105_v52  ;;  %v5286_v60 = vadd.f32 %v3852_v59, %v5195_v54 }
 0x21c   : > { %v3853_v61 = vpop.f32.mrb[80].mxu0  ;;  %v3917_v30 = vpop.f32.mrb[80].mxu1 }
 0x21d   : > { %v3854_v4 = vpop.f32.mrb[81].mxu0  ;;  %v3918_v6 = vpop.f32.mrb[81].mxu1 }
 0x21e   : > { %v3855_v3 = vadd.f32 %v3854_v4, %v3853_v61  ;;  %v3919_v9 = vadd.f32 %v3918_v6, %v3917_v30  ;;  %v3856_v15 = vpop.f32.mrb[82].mxu0  ;;  %v3920_v44 = vpop.f32.mrb[82].mxu1 }
 0x21f   : > { %v3857_v32 = vpop.f32.mrb[83].mxu0  ;;  %v3921_v46 = vpop.f32.mrb[83].mxu1 }
 0x220   : > { %v5289_v34 = vadd.f32 %v3855_v3, %v5197_v10  ;;  %v3858_v62 = vadd.f32 %v3857_v32, %v3856_v15  ;;  %v3922_v53 = vadd.f32 %v3921_v46, %v3920_v44  ;;  %v5292_v52 = vadd.f32 %v3919_v9, %v5200_v2 }
 0x222   : > { %v5295_v54 = vadd.f32 %v3858_v62, %v5202_v63  ;;  %v5298_v12 = vadd.f32 %v3922_v53, %v5205_v16 }
 0x224   : > { %v3859_v24 = vpop.f32.mrb[84].mxu0  ;;  %v3923_v27 = vpop.f32.mrb[84].mxu1 }
 0x225   : > { %v3860_v20 = vpop.f32.mrb[85].mxu0  ;;  %v3924_v31 = vpop.f32.mrb[85].mxu1 }
 0x226   : > { %v3861_v43 = vadd.f32 %v3860_v20, %v3859_v24  ;;  %v3925_v40 = vadd.f32 %v3924_v31, %v3923_v27  ;;  %v3862_v38 = vpop.f32.mrb[86].mxu0  ;;  %v3926_v10 = vpop.f32.mrb[86].mxu1 }
 0x227   : > { %v3863_v14 = vpop.f32.mrb[87].mxu0  ;;  %v3927_v48 = vpop.f32.mrb[87].mxu1 }
 0x228   : > { %v5301_v45 = vadd.f32 %v3861_v43, %v5207_v22  ;;  %v3864_v2 = vadd.f32 %v3863_v14, %v3862_v38  ;;  %v3928_v57 = vadd.f32 %v3927_v48, %v3926_v10  ;;  %v5304_v63 = vadd.f32 %v3925_v40, %v5210_v8 }
 0x22a   : > { %v5307_v16 = vadd.f32 %v3864_v2, %v5212_v25  ;;  %v5310_v28 = vadd.f32 %v3928_v57, %v5215_v11 }
 0x22c   : > { %v3865_v49 = vpop.f32.mrb[88].mxu0  ;;  %v3929_v51 = vpop.f32.mrb[88].mxu1 }
 0x22d   : > { %v3866_v36 = vpop.f32.mrb[89].mxu0  ;;  %v3930_v59 = vpop.f32.mrb[89].mxu1 }
 0x22e   : > { %v3867_v61 = vadd.f32 %v3866_v36, %v3865_v49  ;;  %v3931_v30 = vadd.f32 %v3930_v59, %v3929_v51  ;;  %v3868_v4 = vpop.f32.mrb[90].mxu0  ;;  %v3932_v22 = vpop.f32.mrb[90].mxu1 }
 0x22f   : > { %v3869_v6 = vpop.f32.mrb[91].mxu0  ;;  %v3933_v3 = vpop.f32.mrb[91].mxu1 }
 0x230   : > { %v5313_v9 = vadd.f32 %v3867_v61, %v5218_v29  ;;  %v3870_v8 = vadd.f32 %v3869_v6, %v3868_v4  ;;  %v3934_v15 = vadd.f32 %v3933_v3, %v3932_v22  ;;  %v5316_v25 = vadd.f32 %v3931_v30, %v5221_v47 }
 0x232   : > { %v5319_v11 = vadd.f32 %v3870_v8, %v5223_v33  ;;  %v5322_v44 = vadd.f32 %v3934_v15, %v5226_v21 }
 0x234   : > { %v3871_v32 = vpop.f32.mrb[92].mxu0  ;;  %v3935_v46 = vpop.f32.mrb[92].mxu1 }
 0x235   : > { %v3872_v62 = vpop.f32.mrb[93].mxu0  ;;  %v3936_v53 = vpop.f32.mrb[93].mxu1 }
 0x236   : > { %v3873_v24 = vadd.f32 %v3872_v62, %v3871_v32  ;;  %v3937_v27 = vadd.f32 %v3936_v53, %v3935_v46  ;;  %v3874_v20 = vpop.f32.mrb[94].mxu0  ;;  %v3938_v29 = vpop.f32.mrb[94].mxu1 }
 0x237   : > { %v3875_v31 = vpop.f32.mrb[95].mxu0  ;;  %v3939_v43 = vpop.f32.mrb[95].mxu1 }
 0x238   : > { %v5325_v40 = vadd.f32 %v3873_v24, %v5229_v50  ;;  %v3876_v47 = vadd.f32 %v3875_v31, %v3874_v20  ;;  %v3940_v38 = vadd.f32 %v3939_v43, %v3938_v29  ;;  %v5328_v33 = vadd.f32 %v3937_v27, %v5232_v23 }
 0x23a   : > { %v5331_v21 = vadd.f32 %v3876_v47, %v5235_v55  ;;  %v5334_v10 = vadd.f32 %v3940_v38, %v5238_v19 }
 0x23c   : > { %v3877_v14 = vpop.f32.mrb[96].mxu0  ;;  %v3941_v48 = vpop.f32.mrb[96].mxu1 }
 0x23d   : > { %v3878_v2 = vpop.f32.mrb[97].mxu0  ;;  %v3942_v57 = vpop.f32.mrb[97].mxu1 }
 0x23e   : > { %v3879_v49 = vadd.f32 %v3878_v2, %v3877_v14  ;;  %v3943_v51 = vadd.f32 %v3942_v57, %v3941_v48  ;;  %v3880_v36 = vpop.f32.mrb[98].mxu0  ;;  %v3944_v50 = vpop.f32.mrb[98].mxu1 }
 0x23f   : > { %v3881_v59 = vpop.f32.mrb[99].mxu0  ;;  %v3945_v61 = vpop.f32.mrb[99].mxu1 }
 0x240   : > { %v5337_v30 = vadd.f32 %v3879_v49, %v5241_v13  ;;  %v3882_v23 = vadd.f32 %v3881_v59, %v3880_v36  ;;  %v3946_v4 = vadd.f32 %v3945_v61, %v3944_v50  ;;  %v5340_v55 = vadd.f32 %v3943_v51, %v5244_v41 }
 0x242   : > { %v5343_v19 = vadd.f32 %v3882_v23, %v5247_v17  ;;  %v5346_v22 = vadd.f32 %v3946_v4, %v5250_v42 }
 0x244   : > { %v3883_v6 = vpop.f32.mrb[100].mxu0  ;;  %v3947_v3 = vpop.f32.mrb[100].mxu1 }
 0x245   : > { %v3884_v8 = vpop.f32.mrb[101].mxu0  ;;  %v3948_v15 = vpop.f32.mrb[101].mxu1 }
 0x246   : > { %v3885_v32 = vadd.f32 %v3884_v8, %v3883_v6  ;;  %v3949_v46 = vadd.f32 %v3948_v15, %v3947_v3  ;;  %v3886_v62 = vpop.f32.mrb[102].mxu0  ;;  %v3950_v13 = vpop.f32.mrb[102].mxu1 }
 0x247   : > { %v3887_v53 = vpop.f32.mrb[103].mxu0  ;;  %v3951_v24 = vpop.f32.mrb[103].mxu1 }
 0x248   : > { %v5349_v27 = vadd.f32 %v3885_v32, %v5253_v35  ;;  %v3888_v41 = vadd.f32 %v3887_v53, %v3886_v62  ;;  %v3952_v20 = vadd.f32 %v3951_v24, %v3950_v13  ;;  %v5352_v17 = vadd.f32 %v3949_v46, %v5256_v1 }
 0x24a   : > { %v5355_v42 = vadd.f32 %v3888_v41, %v5259_v39  ;;  %v5358_v29 = vadd.f32 %v3952_v20, %v5262_v7  ;;  %v5384_v41 = vld [vmem:[#allocation8] ss:$0 sm:$0xff] }
 0x24c   : > { %v3889_v31 = vpop.f32.mrb[104].mxu0  ;;  %v3953_v43 = vpop.f32.mrb[104].mxu1 }
 0x24d   : > { %v3890_v47 = vpop.f32.mrb[105].mxu0  ;;  %v3954_v38 = vpop.f32.mrb[105].mxu1 }
 0x24e   : > { %v3891_v14 = vadd.f32 %v3890_v47, %v3889_v31  ;;  %v3955_v48 = vadd.f32 %v3954_v38, %v3953_v43  ;;  %v3892_v2 = vpop.f32.mrb[106].mxu0  ;;  %v3956_v35 = vpop.f32.mrb[106].mxu1  ;;  %v5387_v43 = vld [vmem:[#allocation9] ss:$0 sm:$0xff] }
 0x24f   : > { %v3893_v57 = vpop.f32.mrb[107].mxu0  ;;  %v3957_v49 = vpop.f32.mrb[107].mxu1 }
 0x250   : > { %v5361_v51 = vadd.f32 %v3891_v14, %v5265_v0  ;;  %v3894_v1 = vadd.f32 %v3893_v57, %v3892_v2  ;;  %v3958_v36 = vadd.f32 %v3957_v49, %v3956_v35  ;;  %v5364_v39 = vadd.f32 %v3955_v48, %v5268_v5 }
 0x252   : > { %v5367_v7 = vadd.f32 %v3894_v1, %v5271_v58  ;;  %v5370_v50 = vadd.f32 %v3958_v36, %v5274_v26 }
 0x254   : > { %v3895_v59 = vpop.f32.mrb[108].mxu0  ;;  %v3959_v61 = vpop.f32.mrb[108].mxu1 }
 0x255   : > { %v3896_v23 = vpop.f32.mrb[109].mxu0  ;;  %v3960_v4 = vpop.f32.mrb[109].mxu1 }
 0x256   : > { %v3897_v6 = vadd.f32 %v3896_v23, %v3895_v59  ;;  %v3961_v3 = vadd.f32 %v3960_v4, %v3959_v61  ;;  %v3898_v8 = vpop.f32.mrb[110].mxu0  ;;  %v3962_v0 = vpop.f32.mrb[110].mxu1 }
 0x257   : > { %v3899_v15 = vpop.f32.mrb[111].mxu0  ;;  %v3963_v32 = vpop.f32.mrb[111].mxu1 }
 0x258   : > { %v5373_v46 = vadd.f32 %v3897_v6, %v5277_v37  ;;  %v3900_v5 = vadd.f32 %v3899_v15, %v3898_v8  ;;  %v3964_v62 = vadd.f32 %v3963_v32, %v3962_v0  ;;  %v5376_v58 = vadd.f32 %v3961_v3, %v5280_v56 }
 0x25a   : > { %v5379_v26 = vadd.f32 %v3900_v5, %v5283_v18  ;;  %v5382_v13 = vadd.f32 %v3964_v62, %v5286_v60 }
 0x25c   : > { %v3965_v53 = vpop.f32.mrb[112].mxu1  ;;  %v4055_v24 = vpop.f32.mrb[112].mxu0 }
 0x25d   : > { %v2539_v20 = vadd.f32 %v4055_v24, %v5304_v63  ;;  %v3966_v31 = vpop.f32.mrb[113].mxu1  ;;  %v2530_v37 = vpop.f32.mrb[113].mxu0 }
 0x25e   : > { %v3967_v47 = vadd.f32 %v3966_v31, %v3965_v53  ;;  %v2531_v56 = vadd.f32 %v2530_v37, %v5292_v52  ;;  %v3968_v38 = vpop.f32.mrb[114].mxu1  ;;  %v4056_v18 = vpop.f32.mrb[114].mxu0 }
 0x25f   : > { %v2765_v14 = vmul.f32 %v5384_v41, %v2539_v20  ;;  %v2542_v60 = vadd.f32 %v4056_v18, %v5310_v28  ;;  %v3969_v48 = vpop.f32.mrb[115].mxu1  ;;  %v2533_v2 = vpop.f32.mrb[115].mxu0 }
 0x260   : > { %v2763_v35 = vmul.f32 %v5384_v41, %v2531_v56  ;;  %v3970_v57 = vadd.f32 %v3969_v48, %v3968_v38  ;;  %v2534_v63 = vadd.f32 %v2533_v2, %v5298_v12  ;;  %v5395_v49 = vadd.f32 %v3967_v47, %v5289_v34 }
 0x261   : > { %v2804_v1 = vadd.f32 %v5387_v43, %v2765_v14  ;;  %v2766_v52 = vmul.f32 %v5384_v41, %v2542_v60 }
 0x262   : > { %v2802_v36 = vadd.f32 %v5387_v43, %v2763_v35  ;;  %v2764_v59 = vmul.f32 %v5384_v41, %v2534_v63  ;;  %v5402_v28 = vadd.f32 %v3970_v57, %v5295_v54 }
 0x263   : > { %v2805_v61 = vadd.f32 %v5387_v43, %v2766_v52  ;;  %v2836_v34 = vmax.f32 %v2804_v1, 0.0 }
 0x264   : > { %v2803_v23 = vadd.f32 %v5387_v43, %v2764_v59  ;;  %v3971_v12 = vpop.f32.mrb[116].mxu1  ;;  %v4059_v4 = vpop.f32.mrb[116].mxu0  ;;  %v2834_v15 = vmax.f32 %v2802_v36, 0.0 }
 0x265   : > { %v2837_v6 = vmax.f32 %v2805_v61, 0.0  ;;  %v2555_v3 = vadd.f32 %v4059_v4, %v5328_v33  ;;  %v3972_v8 = vpop.f32.mrb[117].mxu1  ;;  %v2546_v0 = vpop.f32.mrb[117].mxu0 }
 0x266   : > { %v2835_v32 = vmax.f32 %v2803_v23, 0.0  ;;  %v3973_v5 = vadd.f32 %v3972_v8, %v3971_v12  ;;  %v2547_v62 = vadd.f32 %v2546_v0, %v5316_v25  ;;  %v3974_v54 = vpop.f32.mrb[118].mxu1  ;;  %v4060_v53 = vpop.f32.mrb[118].mxu0 }
 0x267   : > { %v3478_v24 = vpack.c.bf16 %v2837_v6, %v2836_v34  ;;  %v2769_v20 = vmul.f32 %v5384_v41, %v2555_v3  ;;  %v2558_v31 = vadd.f32 %v4060_v53, %v5334_v10  ;;  %v3975_v37 = vpop.f32.mrb[119].mxu1  ;;  %v2549_v47 = vpop.f32.mrb[119].mxu0 }
 0x268   : > { %v3473_v56 = vpack.c.bf16 %v2835_v32, %v2834_v15  ;;  %v2767_v38 = vmul.f32 %v5384_v41, %v2547_v62  ;;  %v3976_v33 = vadd.f32 %v3975_v37, %v3974_v54  ;;  %v2550_v18 = vadd.f32 %v2549_v47, %v5322_v44 }
 0x269   : > { %3550 = vst [vmem:[%s5413_s25 + $0x8] sm:$0xff] %v3478_v24   ;;  %v2808_v25 = vadd.f32 %v5387_v43, %v2769_v20  ;;  %v2770_v14 = vmul.f32 %v5384_v41, %v2558_v31  ;;  %v5419_v60 = vadd.f32 %v3973_v5, %v5301_v45 }
 0x26a   : > { %3474 = vst [vmem:[%s5413_s25] sm:$0xff] %v3473_v56   ;;  %v2806_v10 = vadd.f32 %v5387_v43, %v2767_v38  ;;  %v2768_v48 = vmul.f32 %v5384_v41, %v2550_v18  ;;  %v5425_v2 = vadd.f32 %v3976_v33, %v5307_v16 }
 0x26b   : > { %v2809_v44 = vadd.f32 %v5387_v43, %v2770_v14  ;;  %v2840_v1 = vmax.f32 %v2808_v25, 0.0 }
 0x26c   : > { %v2807_v35 = vadd.f32 %v5387_v43, %v2768_v48  ;;  %v3977_v57 = vpop.f32.mrb[120].mxu1  ;;  %v4063_v63 = vpop.f32.mrb[120].mxu0  ;;  %v2838_v61 = vmax.f32 %v2806_v10, 0.0 }
 0x26d   : > { %v2841_v52 = vmax.f32 %v2809_v44, 0.0  ;;  %v2571_v36 = vadd.f32 %v4063_v63, %v5352_v17  ;;  %v3978_v45 = vpop.f32.mrb[121].mxu1  ;;  %v2562_v59 = vpop.f32.mrb[121].mxu0 }
 0x26e   : > { %v2839_v23 = vmax.f32 %v2807_v35, 0.0  ;;  %v3979_v12 = vadd.f32 %v3978_v45, %v3977_v57  ;;  %v2563_v4 = vadd.f32 %v2562_v59, %v5340_v55  ;;  %v3980_v16 = vpop.f32.mrb[122].mxu1  ;;  %v4064_v34 = vpop.f32.mrb[122].mxu0 }
 0x26f   : > { %v3488_v6 = vpack.c.bf16 %v2841_v52, %v2840_v1  ;;  %v2773_v3 = vmul.f32 %v5384_v41, %v2571_v36  ;;  %v2574_v8 = vadd.f32 %v4064_v34, %v5358_v29  ;;  %v3981_v0 = vpop.f32.mrb[123].mxu1  ;;  %v2565_v15 = vpop.f32.mrb[123].mxu0 }
 0x270   : > { %v3483_v32 = vpack.c.bf16 %v2839_v23, %v2838_v61  ;;  %v2771_v17 = vmul.f32 %v5384_v41, %v2563_v4  ;;  %v3982_v5 = vadd.f32 %v3981_v0, %v3980_v16  ;;  %v2566_v62 = vadd.f32 %v2565_v15, %v5346_v22 }
 0x271   : > { %3552 = vst [vmem:[%s5413_s25 + $0x18] sm:$0xff] %v3488_v6   ;;  %v2812_v54 = vadd.f32 %v5387_v43, %v2773_v3  ;;  %v2774_v55 = vmul.f32 %v5384_v41, %v2574_v8  ;;  %v5439_v53 = vadd.f32 %v3979_v12, %v5313_v9 }
 0x272   : > { %3551 = vst [vmem:[%s5413_s25 + $0x10] sm:$0xff] %v3483_v32   ;;  %v2810_v24 = vadd.f32 %v5387_v43, %v2771_v17  ;;  %v2772_v29 = vmul.f32 %v5384_v41, %v2566_v62  ;;  %v5445_v20 = vadd.f32 %v3982_v5, %v5319_v11 }
 0x273   : > { %v2813_v31 = vadd.f32 %v5387_v43, %v2774_v55  ;;  %v2844_v56 = vmax.f32 %v2812_v54, 0.0 }
 0x274   : > { %v2811_v22 = vadd.f32 %v5387_v43, %v2772_v29  ;;  %v3983_v37 = vpop.f32.mrb[124].mxu1  ;;  %v4067_v47 = vpop.f32.mrb[124].mxu0  ;;  %v2842_v25 = vmax.f32 %v2810_v24, 0.0 }
 0x275   : > { %v2845_v38 = vmax.f32 %v2813_v31, 0.0  ;;  %v2587_v33 = vadd.f32 %v4067_v47, %v5376_v58  ;;  %v3984_v9 = vpop.f32.mrb[125].mxu1  ;;  %v2578_v18 = vpop.f32.mrb[125].mxu0 }
 0x276   : > { %v2843_v14 = vmax.f32 %v2811_v22, 0.0  ;;  %v3985_v10 = vadd.f32 %v3984_v9, %v3983_v37  ;;  %v2579_v48 = vadd.f32 %v2578_v18, %v5364_v39  ;;  %v3986_v11 = vpop.f32.mrb[126].mxu1  ;;  %v4068_v44 = vpop.f32.mrb[126].mxu0 }
 0x277   : > { %v3498_v35 = vpack.c.bf16 %v2845_v38, %v2844_v56  ;;  %v2777_v57 = vmul.f32 %v5384_v41, %v2587_v33  ;;  %v2590_v63 = vadd.f32 %v4068_v44, %v5382_v13  ;;  %v3987_v1 = vpop.f32.mrb[127].mxu1  ;;  %v2581_v52 = vpop.f32.mrb[127].mxu0 }
 0x278   : > { %v3493_v36 = vpack.c.bf16 %v2843_v14, %v2842_v25  ;;  %v2775_v58 = vmul.f32 %v5384_v41, %v2579_v48  ;;  %v3988_v45 = vadd.f32 %v3987_v1, %v3986_v11  ;;  %v2582_v59 = vadd.f32 %v2581_v52, %v5370_v50 }
 0x279   : > { %3554 = vst [vmem:[%s5413_s25 + $0x28] sm:$0xff] %v3498_v35   ;;  %v2816_v61 = vadd.f32 %v5387_v43, %v2777_v57  ;;  %v2778_v39 = vmul.f32 %v5384_v41, %v2590_v63  ;;  %v2458_v23 = vadd.f32 %v3985_v10, %v5325_v40 }
 0x27a   : > { %3553 = vst [vmem:[%s5413_s25 + $0x20] sm:$0xff] %v3493_v36   ;;  %v2814_v12 = vadd.f32 %v5387_v43, %v2775_v58  ;;  %v2776_v13 = vmul.f32 %v5384_v41, %v2582_v59  ;;  %v2461_v4 = vadd.f32 %v3988_v45, %v5331_v21 }
 0x27b   : > { %v2817_v16 = vadd.f32 %v5387_v43, %v2778_v39  ;;  %v2848_v3 = vmax.f32 %v2816_v61, 0.0 }
 0x27c   : > { %v2815_v34 = vadd.f32 %v5387_v43, %v2776_v13  ;;  %v3989_v6 = vpop.f32.mrb[128].mxu1  ;;  %v4071_v50 = vpop.f32.mrb[128].mxu0  ;;  %v2846_v40 = vmax.f32 %v2814_v12, 0.0 }
 0x27d   : > { %v2849_v8 = vmax.f32 %v2817_v16, 0.0  ;;  %v2603_v0 = vadd.f32 %v4071_v50, %v5419_v60  ;;  %v3990_v15 = vpop.f32.mrb[129].mxu1  ;;  %v2594_v32 = vpop.f32.mrb[129].mxu0 }
 0x27e   : > { %v2847_v17 = vmax.f32 %v2815_v34, 0.0  ;;  %v3991_v5 = vadd.f32 %v3990_v15, %v3989_v6  ;;  %v2595_v62 = vadd.f32 %v2594_v32, %v5395_v49  ;;  %v3992_v21 = vpop.f32.mrb[130].mxu1  ;;  %v4072_v54 = vpop.f32.mrb[130].mxu0 }
 0x27f   : > { %v3508_v55 = vpack.c.bf16 %v2849_v8, %v2848_v3  ;;  %v2781_v24 = vmul.f32 %v5384_v41, %v2603_v0  ;;  %v2606_v29 = vadd.f32 %v4072_v54, %v5425_v2  ;;  %v3993_v31 = vpop.f32.mrb[131].mxu1  ;;  %v2597_v22 = vpop.f32.mrb[131].mxu0 }
 0x280   : > { %v3503_v37 = vpack.c.bf16 %v2847_v17, %v2846_v40  ;;  %v2779_v60 = vmul.f32 %v5384_v41, %v2595_v62  ;;  %v3994_v47 = vadd.f32 %v3993_v31, %v3992_v21  ;;  %v2598_v56 = vadd.f32 %v2597_v22, %v5402_v28 }
 0x281   : > { %3556 = vst [vmem:[%s5413_s25 + $0x38] sm:$0xff] %v3508_v55   ;;  %v2820_v38 = vadd.f32 %v5387_v43, %v2781_v24  ;;  %v2782_v49 = vmul.f32 %v5384_v41, %v2606_v29  ;;  %v2466_v33 = vadd.f32 %v3991_v5, %v5337_v30 }
 0x282   : > { %3555 = vst [vmem:[%s5413_s25 + $0x30] sm:$0xff] %v3503_v37   ;;  %v2818_v9 = vadd.f32 %v5387_v43, %v2779_v60  ;;  %v2780_v2 = vmul.f32 %v5384_v41, %v2598_v56  ;;  %v2469_v18 = vadd.f32 %v3994_v47, %v5343_v19 }
 0x283   : > { %v2821_v25 = vadd.f32 %v5387_v43, %v2782_v49  ;;  %v2852_v48 = vmax.f32 %v2820_v38, 0.0 }
 0x284   : > { %v2819_v14 = vadd.f32 %v5387_v43, %v2780_v2  ;;  %v3995_v10 = vpop.f32.mrb[132].mxu1  ;;  %v4075_v28 = vpop.f32.mrb[132].mxu0  ;;  %v2850_v30 = vmax.f32 %v2818_v9, 0.0 }
 0x285   : > { %v2853_v11 = vmax.f32 %v2821_v25, 0.0  ;;  %v2619_v44 = vadd.f32 %v4075_v28, %v2458_v23  ;;  %v3996_v35 = vpop.f32.mrb[133].mxu1  ;;  %v2610_v57 = vpop.f32.mrb[133].mxu0 }
 0x286   : > { %v2851_v63 = vmax.f32 %v2819_v14, 0.0  ;;  %v3997_v1 = vadd.f32 %v3996_v35, %v3995_v10  ;;  %v2611_v52 = vadd.f32 %v2610_v57, %v5439_v53  ;;  %v3998_v36 = vpop.f32.mrb[134].mxu1  ;;  %v4076_v19 = vpop.f32.mrb[134].mxu0 }
 0x287   : > { %v3518_v58 = vpack.c.bf16 %v2853_v11, %v2852_v48  ;;  %v2785_v45 = vmul.f32 %v5384_v41, %v2619_v44  ;;  %v2622_v59 = vadd.f32 %v4076_v19, %v2461_v4  ;;  %v3999_v61 = vpop.f32.mrb[135].mxu1  ;;  %v2613_v39 = vpop.f32.mrb[135].mxu0 }
 0x288   : > { %v3513_v12 = vpack.c.bf16 %v2851_v63, %v2850_v30  ;;  %v2783_v23 = vmul.f32 %v5384_v41, %v2611_v52  ;;  %v4000_v13 = vadd.f32 %v3999_v61, %v3998_v36  ;;  %v2614_v16 = vadd.f32 %v2613_v39, %v5445_v20 }
 0x289   : > { %3558 = vst [vmem:[%s5413_s25 + $0x48] sm:$0xff] %v3518_v58   ;;  %v2824_v34 = vadd.f32 %v5387_v43, %v2785_v45  ;;  %v2786_v53 = vmul.f32 %v5384_v41, %v2622_v59  ;;  %v2474_v6 = vadd.f32 %v3997_v1, %v5349_v27 }
 0x28a   : > { %3557 = vst [vmem:[%s5413_s25 + $0x40] sm:$0xff] %v3513_v12   ;;  %v2822_v50 = vadd.f32 %v5387_v43, %v2783_v23  ;;  %v2784_v4 = vmul.f32 %v5384_v41, %v2614_v16  ;;  %v2477_v3 = vadd.f32 %v4000_v13, %v5355_v42 }
 0x28b   : > { %v2825_v8 = vadd.f32 %v5387_v43, %v2786_v53  ;;  %v2856_v32 = vmax.f32 %v2824_v34, 0.0 }
 0x28c   : > { %v2823_v0 = vadd.f32 %v5387_v43, %v2784_v4  ;;  %v4001_v15 = vpop.f32.mrb[136].mxu1  ;;  %v4079_v20 = vpop.f32.mrb[136].mxu0  ;;  %v2854_v27 = vmax.f32 %v2822_v50, 0.0 }
 0x28d   : > { %v2857_v40 = vmax.f32 %v2825_v8, 0.0  ;;  %v2635_v17 = vadd.f32 %v4079_v20, %v2474_v6  ;;  %v4002_v5 = vpop.f32.mrb[137].mxu1  ;;  %v2626_v62 = vpop.f32.mrb[137].mxu0 }
 0x28e   : > { %v2855_v21 = vmax.f32 %v2823_v0, 0.0  ;;  %v4003_v54 = vadd.f32 %v4002_v5, %v4001_v15  ;;  %v2627_v55 = vadd.f32 %v2626_v62, %v2466_v33  ;;  %v4004_v24 = vpop.f32.mrb[138].mxu1  ;;  %v4080_v29 = vpop.f32.mrb[138].mxu0 }
 0x28f   : > { %v3528_v42 = vpack.c.bf16 %v2857_v40, %v2856_v32  ;;  %v2789_v31 = vmul.f32 %v5384_v41, %v2635_v17  ;;  %v2638_v22 = vadd.f32 %v4080_v29, %v2477_v3  ;;  %v4005_v37 = vpop.f32.mrb[139].mxu1  ;;  %v2629_v60 = vpop.f32.mrb[139].mxu0 }
 0x290   : > { %v3523_v47 = vpack.c.bf16 %v2855_v21, %v2854_v27  ;;  %v2787_v56 = vmul.f32 %v5384_v41, %v2627_v55  ;;  %v4006_v38 = vadd.f32 %v4005_v37, %v4004_v24  ;;  %v2630_v49 = vadd.f32 %v2629_v60, %v2469_v18 }
 0x291   : > { %3560 = vst [vmem:[%s5413_s25 + $0x58] sm:$0xff] %v3528_v42   ;;  %v2828_v9 = vadd.f32 %v5387_v43, %v2789_v31  ;;  %v2790_v2 = vmul.f32 %v5384_v41, %v2638_v22  ;;  %v2482_v33 = vadd.f32 %v4003_v54, %v5361_v51 }
 0x292   : > { %3559 = vst [vmem:[%s5413_s25 + $0x50] sm:$0xff] %v3523_v47   ;;  %v2826_v25 = vadd.f32 %v5387_v43, %v2787_v56  ;;  %v2788_v14 = vmul.f32 %v5384_v41, %v2630_v49  ;;  %v2485_v10 = vadd.f32 %v4006_v38, %v5367_v7 }
 0x293   : > { %v2829_v28 = vadd.f32 %v5387_v43, %v2790_v2  ;;  %v2860_v44 = vmax.f32 %v2828_v9, 0.0 }
 0x294   : > { %v2827_v48 = vadd.f32 %v5387_v43, %v2788_v14  ;;  %v4007_v11 = vpop.f32.mrb[140].mxu1  ;;  %v4083_v18 = vpop.f32.mrb[140].mxu0  ;;  %v2858_v51 = vmax.f32 %v2826_v25, 0.0 }
 0x295   : > { %v2861_v35 = vmax.f32 %v2829_v28, 0.0  ;;  %v4008_v57 = vpop.f32.mrb[141].mxu1  ;;  %v2642_v30 = vpop.f32.mrb[141].mxu0 }
 0x296   : > { %v2859_v63 = vmax.f32 %v2827_v48, 0.0  ;;  %v4009_v1 = vadd.f32 %v4008_v57, %v4007_v11  ;;  %v2643_v52 = vadd.f32 %v2642_v30, %v2482_v33  ;;  %v4010_v36 = vpop.f32.mrb[142].mxu1  ;;  %v4084_v19 = vpop.f32.mrb[142].mxu0 }
 0x297   : > { %v3538_v58 = vpack.c.bf16 %v2861_v35, %v2860_v44  ;;  %v4011_v7 = vpop.f32.mrb[143].mxu1  ;;  %v2645_v45 = vpop.f32.mrb[143].mxu0 }
 0x298   : > { %v3533_v59 = vpack.c.bf16 %v2859_v63, %v2858_v51  ;;  %v2490_v61 = vadd.f32 %v4009_v1, %v5373_v46  ;;  %v2791_v39 = vmul.f32 %v5384_v41, %v2643_v52  ;;  %v4012_v12 = vadd.f32 %v4011_v7, %v4010_v36 }
 0x299   : > { %3562 = vst [vmem:[%s5413_s25 + $0x68] sm:$0xff] %v3538_v58   ;;  %v2646_v23 = vadd.f32 %v2645_v45, %v2485_v10 }
 0x29a   : > { %3561 = vst [vmem:[%s5413_s25 + $0x60] sm:$0xff] %v3533_v59   ;;  %v2651_v13 = vadd.f32 %v4083_v18, %v2490_v61  ;;  %v2493_v16 = vadd.f32 %v4012_v12, %v5379_v26  ;;  %v2830_v34 = vadd.f32 %v5387_v43, %v2791_v39 }
 0x29b   : > { %v2792_v53 = vmul.f32 %v5384_v41, %v2646_v23 }
 0x29c   : > { %v2793_v6 = vmul.f32 %v5384_v41, %v2651_v13  ;;  %v2654_v50 = vadd.f32 %v4084_v19, %v2493_v16  ;;  %v2862_v8 = vmax.f32 %v2830_v34, 0.0 }
 0x29d   : > { %v2831_v46 = vadd.f32 %v5387_v43, %v2792_v53 }
 0x29e   : > { %v2832_v4 = vadd.f32 %v5387_v43, %v2793_v6  ;;  %v2794_v3 = vmul.f32 %v5384_v41, %v2654_v50 }
 0x29f   : > { %v2863_v0 = vmax.f32 %v2831_v46, 0.0 }
 0x2a0   : > { %v2833_v26 = vadd.f32 %v5387_v43, %v2794_v3  ;;  %v2864_v20 = vmax.f32 %v2832_v4, 0.0 }
 0x2a1   : > { %v3543_v15 = vpack.c.bf16 %v2863_v0, %v2862_v8 }
 0x2a2   : > { %v2865_v32 = vmax.f32 %v2833_v26, 0.0 }
 0x2a3   : > { %3563 = vst [vmem:[%s5413_s25 + $0x70] sm:$0xff] %v3543_v15  }
 0x2a4   : > { %v3548_v41 = vpack.c.bf16 %v2865_v32, %v2864_v20 }
 0x2a6   : > { %3564 = vst [vmem:[%s5413_s25 + $0x78] sm:$0xff] %v3548_v41  }
 0x2a7   : > { %4610 = shalt.err (!%p4607_p0)
}
 0x2a8   : > { %s4611_s29 = scalar_lea.hbm %s5525_s6, 2048  ;;  %s4615_s10 = scalar_lea.hbm %s5581_s4, 4096 }
 0x2a9   : > { %p4612_p4 = scmp.ne.s32.totalorder %s5525_s6, %s4611_s29  ;;  %p4616_p12 = scmp.lt.u32.totalorder %s5525_s6, %s5581_s4 }
 0x2aa   : > { %p4617_p1 = scmp.lt.u32.totalorder %s4615_s10, %s4611_s29  ;;  %p4619_p13 = scmp.lt.u32.totalorder %s4611_s29, %s5525_s6 }
 0x2ab   : > { %p4613_p2 = pnand %p4612_p4, %p4877_p10 }
 0x2ac   : > { %p4618_p11 = por %p4617_p1, %p4616_p12 }
 0x2ad   : > { %p4614_p8 = pneg %p4613_p2 }
 0x2ae   : > { %p4620_p6 = por %p4619_p13, %p4618_p11 }
 0x2b0   : > { %p4621_p3 = pnand %p4620_p6, %p4614_p8 }
 0x2b2   : > { %4624 = shalt.err (!%p4621_p3)
}
 0x2b3   : > { %s4698_s25 = smov 64   ;;  %s4699_s27 = smov 4  }
 0x2b4   : > { %4118 = dma.vmem_to_hbm [thread:$0]  (%p4877_p10), %s5527_s11, 2048, %s5525_s6, %s3027_s7, %s4698_s25, %s4698_s25, %s4699_s27  }
 0x2b5 PF: > { %s5601_s21 = sld [smem:[#allocation16_spill]]  ;;  %s3056_s28 = sand.u32 1, %s4667_s15  }
 0x2b6   : > { %p5603_p7 = scmp.ge.s32.totalorder %s4687_s20, 2  ;;  %s3057_s8 = scalar_lea.sflag [#allocation5], %s3056_s28 }
 0x2bb   : > { %p5602_p5 = scmp.ne.s32.totalorder %s5601_s21, 0 }
 0x2bd   : > { %p4135_p9 = pnand %p5603_p7, %p5602_p5 }
 0x2bf   : > { %4662 = dma.done.wait (!%p4135_p9), %s3057_s8, 2048  }
 0x2c0   : > { %4664 = vsyncadd (!%p4135_p9), %s3057_s8, 4294965248  ;;  %s22_s20 = sadd.s32 1, %s4687_s20   ;;  %s5604_s15 = smov %s4671_s16 }
 0x2c1   : > { %p19_p0 = scmp.ge.s32.totalorder %s22_s20, 4   ;;  %s5605_s16 = smov %s4675_s17 }
 0x2c2   : > { %s5606_s17 = smov %s4893_s24  ;;  %s5607_s18 = smov %s4683_s19 }
 0x2c3   : > { %s5608_s19 = smov %s5610_s26  ;;  %21 = sbr.rel (!%p19_p0) target bundleno = 8 (0x8), region = 104 }
 0x2ca   :  { %3062 = vsyncpa [#allocation4], 1 }
 0x2cb   :  { %3064 = vsyncpa [#allocation4 + $0x1], 1 }
 0x2cc   :  { %3065 = vsyncpa [#allocation7], 1 }
 0x2cd   :  { %3066 = vsyncpa [#allocation10], 1 }
 0x2ce   :  { %3067 = vsyncpa [#allocation5], 1 }
 0x2cf   :  { %3069 = vsyncpa [#allocation5 + $0x1], 1 }

</bundles_post_ra>
